<compile_context>
chip_gen: v7x
topology: tpu7x:2x2x1
jax: 0.10.0
libtpu: 0.0.40
codegen_flags: <defaults>
</compile_context>

<pallas_src>
from functools import partial

import jax
import jax.numpy as jnp
from jax.experimental import pallas as pl
from jax.experimental.pallas import tpu as pltpu

EPS = 1e-5
COMPUTE_DTYPE = jnp.bfloat16   # MXU operand / DMA dtype (accumulation stays f32)
LANE = 128                     # Cout padded to a multiple of this


def _round_up(x, m):
    return ((x + m - 1) // m) * m


def down_double_conv_kernel(x_ref, w1_ref, s1_ref, b1_ref, w2_ref, s2_ref, b2_ref,
                            o_ref, pad1_ref, pad2_ref):
    """Fused MaxPool2x2 + [Conv3x3 -> folded-BN -> ReLU] x 2 for one batch element.

    x_ref:    (1, 2H, W, 2*Cin)  bf16 input, W axis pre-regrouped as (W, 2*Cin) in wrapper
    w1_ref:   (9*Cin, C1p)       conv1 weights, im2col layout, bf16
    s1_ref:   (1, C1p)   f32     folded BN1 scale (gamma / sqrt(var + eps))
    b1_ref:   (1, C1p)   f32     folded BN1 bias  (beta + (conv_b - mean) * scale)
    w2_ref:   (9*C1p, C2p)       conv2 weights, bf16
    s2_ref:   (1, C2p)   f32
    b2_ref:   (1, C2p)   f32
    o_ref:    (1, H, W, C2p)     bf16 output
    pad1_ref: (H+2, W+2, Cin)    bf16 VMEM scratch (padded pooled input)
    pad2_ref: (H+2, W+2, C1p)    bf16 VMEM scratch (padded conv1 output)
    """
    H = o_ref.shape[1]
    W = o_ref.shape[2]
    Cin = pad1_ref.shape[2]

    # ---- fused 2x2 / stride-2 max pool (bf16) --------------------------------
    x = x_ref[0]                                            # (2H, W, 2*Cin)
    colmax = jnp.maximum(x[:, :, :Cin], x[:, :, Cin:])      # pool over columns (lane slice)
    rows = colmax.reshape(H, 2, W, Cin)                     # split leading dim only (cheap)
    pooled = jnp.maximum(rows[:, 0], rows[:, 1])            # pool over rows -> (H, W, Cin)

    def write_padded(pad_ref, interior):
        # Zero only the two border rows; interior rows are stored once as full-width
        # aligned slabs with the zero side-columns concatenated in-register.
        # (No full-buffer zero, no masked column stores, no program_id gating.)
        hp, wp, c = pad_ref.shape
        zrow = jnp.zeros((1, wp, c), pad_ref.dtype)
        pad_ref[0:1, :, :] = zrow
        pad_ref[hp - 1:hp, :, :] = zrow
        zcol = jnp.zeros((hp - 2, 1, c), pad_ref.dtype)
        pad_ref[1:hp - 1, :, :] = jnp.concatenate(
            [zcol, interior.astype(pad_ref.dtype), zcol], axis=1)

    def conv3x3_bn_relu(pad_ref, w_ref, s_ref, b_ref):
        # im2col: one (H, W, 9*cin) x (9*cin, cout) MXU matmul (bf16 operands, f32 acc)
        # instead of nine K=cin dots.
        taps = [pad_ref[kh:kh + H, kw:kw + W, :]
                for kh in range(3) for kw in range(3)]
        patches = jnp.concatenate(taps, axis=-1)            # (H, W, 9*cin) bf16
        acc = jax.lax.dot_general(
            patches, w_ref[...],
            dimension_numbers=(((2,), (0,)), ((), ())),
            preferred_element_type=jnp.float32)              # (H, W, cout) f32
        return jnp.maximum(acc * s_ref[...] + b_ref[...], 0.0)   # f32 epilogue

    # ---- conv1 + BN + ReLU (zero-pad in VMEM, no HBM pad copy) --------------
    write_padded(pad1_ref, pooled)
    y1 = conv3x3_bn_relu(pad1_ref, w1_ref, s1_ref, b1_ref)   # (H, W, C1p) f32

    # ---- conv2 + BN + ReLU (intermediate never leaves VMEM) -----------------
    write_padded(pad2_ref, y1)
    y2 = conv3x3_bn_relu(pad2_ref, w2_ref, s2_ref, b2_ref)   # (H, W, C2p) f32

    o_ref[...] = y2[None].astype(o_ref.dtype)


def pack_params(params):
    """Fold BN into per-channel scale/bias and repack conv weights to (9*Cin_p, Cout_p),
    with Cout padded to a lane (128) multiple.  Called once, outside the jitted forward."""
    def fold(p, cin_pad):
        cout, cin = p["w"].shape[0], p["w"].shape[1]
        cout_p = _round_up(cout, LANE)
        # (Cout,Cin,3,3) -> (kh,kw,Cin,Cout), zero-pad channels, flatten to
        # (9*cin_pad, cout_p); row index = (kh*3 + kw)*cin_pad + cin.
        w = jnp.transpose(p["w"], (2, 3, 1, 0))
        w = jnp.pad(w, ((0, 0), (0, 0), (0, cin_pad - cin), (0, cout_p - cout)))
        w = w.reshape(9 * cin_pad, cout_p).astype(COMPUTE_DTYPE)
        scale = p["gamma"] / jnp.sqrt(p["var"] + EPS)
        bias = p["beta"] + (p["b"] - p["mean"]) * scale
        scale = jnp.pad(scale, (0, cout_p - cout)).reshape(1, cout_p).astype(jnp.float32)
        bias = jnp.pad(bias, (0, cout_p - cout)).reshape(1, cout_p).astype(jnp.float32)
        return w, scale, bias

    cin = params["conv1"]["w"].shape[1]
    c1 = params["conv1"]["w"].shape[0]
    w1, s1, b1 = fold(params["conv1"], cin)                    # conv1 K = 9*Cin
    w2, s2, b2 = fold(params["conv2"], _round_up(c1, LANE))    # conv2 Cin = padded C1
    return dict(w1=w1, s1=s1, b1=b1, w2=w2, s2=s2, b2=b2)


@partial(jax.jit, static_argnames=("out_ch",))
def down_forward(x_nchw, packed, *, out_ch):
    # NCHW -> NHWC, cast to bf16 fused with the transpose (halves the input HBM read).
    x = jnp.transpose(x_nchw, (0, 2, 3, 1)).astype(COMPUTE_DTYPE)
    N, H0, W0, Cin = x.shape
    H, W = H0 // 2, W0 // 2
    # Free row-major regroup so the 2x2 max pool is a lane-slice max plus a leading-dim
    # max inside the kernel (no pooled intermediate in HBM).
    x4 = x.reshape(N, H0, W, 2 * Cin)

    C1p = packed["s1"].shape[-1]
    C2p = packed["s2"].shape[-1]

    # Explicit scoped-VMEM budget from the actual per-step residency (+50% headroom):
    # double-buffered in/out blocks + weights, pad scratch, im2col slabs, f32 accumulators.
    bpe = 2  # bf16
    est = (2 * (H0 * W * 2 * Cin + H * W * C2p) * bpe
           + 2 * ((9 * Cin * C1p + 9 * C1p * C2p) * bpe + 4 * (C1p + C2p) * 4)
           + (H + 2) * (W + 2) * (Cin + C1p) * bpe
           + H * W * (9 * Cin + 9 * C1p) * bpe
           + H * W * (C1p + C2p) * 4)
    vmem_limit = max(int(1.5 * est), 16 * 1024 * 1024)

    y = pl.pallas_call(
        down_double_conv_kernel,
        out_shape=jax.ShapeDtypeStruct((N, H, W, C2p), COMPUTE_DTYPE),
        grid_spec=pltpu.PrefetchScalarGridSpec(
            num_scalar_prefetch=0,
            grid=(N,),
            in_specs=[
                pl.BlockSpec((1, H0, W, 2 * Cin), lambda n: (n, 0, 0, 0)),
                pl.BlockSpec((9 * Cin, C1p), lambda n: (0, 0)),
                pl.BlockSpec((1, C1p), lambda n: (0, 0)),
                pl.BlockSpec((1, C1p), lambda n: (0, 0)),
                pl.BlockSpec((9 * C1p, C2p), lambda n: (0, 0)),
                pl.BlockSpec((1, C2p), lambda n: (0, 0)),
                pl.BlockSpec((1, C2p), lambda n: (0, 0)),
            ],
            out_specs=pl.BlockSpec((1, H, W, C2p), lambda n: (n, 0, 0, 0)),
            scratch_shapes=[
                pltpu.VMEM((H + 2, W + 2, Cin), COMPUTE_DTYPE),
                pltpu.VMEM((H + 2, W + 2, C1p), COMPUTE_DTYPE),
            ],
        ),
        compiler_params=pltpu.CompilerParams(
            dimension_semantics=("parallel",),
            vmem_limit_bytes=vmem_limit),
    )(x4, packed["w1"], packed["s1"], packed["b1"],
      packed["w2"], packed["s2"], packed["b2"])

    # Drop padded channels, NHWC -> NCHW, back to f32 (PyTorch forward returns f32 NCHW).
    return jnp.transpose(y[..., :out_ch], (0, 3, 1, 2)).astype(jnp.float32)


def init_params(key, in_ch, out_ch):
    ks = jax.random.split(key, 12)
    params = {}
    for i, (ci, co) in enumerate([(in_ch, out_ch), (out_ch, out_ch)]):
        base = 6 * i
        fan = ci * 9
        bound = 1.0 / jnp.sqrt(fan)
        w = jax.random.uniform(ks[base + 0], (co, ci, 3, 3), jnp.float32, -bound, bound)
        b = jax.random.uniform(ks[base + 1], (co,), jnp.float32, -bound, bound)
        gamma = 1.0 + 0.1 * jax.random.normal(ks[base + 2], (co,), jnp.float32)
        beta = 0.1 * jax.random.normal(ks[base + 3], (co,), jnp.float32)
        mean = 0.1 * jax.random.normal(ks[base + 4], (co,), jnp.float32)
        var = 1.0 + 0.1 * jax.random.uniform(ks[base + 5], (co,), jnp.float32)
        params[f"conv{i + 1}"] = dict(w=w, b=b, gamma=gamma, beta=beta, mean=mean, var=var)
    return params


def _reference(x_nchw, params):
    """Pure-JAX reference (inference-BN, same bf16 operand rounding) for correctness."""
    x = jnp.transpose(x_nchw, (0, 2, 3, 1)).astype(jnp.float32)
    N, H0, W0, C = x.shape
    x = x.reshape(N, H0 // 2, 2, W0 // 2, 2, C).max(axis=(2, 4))   # MaxPool2d(2, 2)

    def block(x, p):
        w_hwio = jnp.transpose(p["w"], (2, 3, 1, 0)).astype(COMPUTE_DTYPE)
        y = jax.lax.conv_general_dilated(
            x.astype(COMPUTE_DTYPE), w_hwio, window_strides=(1, 1), padding="SAME",
            dimension_numbers=("NHWC", "HWIO", "NHWC"),
            preferred_element_type=jnp.float32)
        y = y + p["b"]
        y = p["gamma"] * (y - p["mean"]) / jnp.sqrt(p["var"] + EPS) + p["beta"]
        return jnp.maximum(y, 0.0)

    y = block(x, params["conv1"])
    y = block(y, params["conv2"])
    return jnp.transpose(y, (0, 3, 1, 2))


if __name__ == "__main__":
    key = jax.random.PRNGKey(0)
    k_x, k_p = jax.random.split(key)

    N, in_ch, out_ch, HW = 2, 4, 8, 16
    x = jax.random.normal(k_x, (N, in_ch, HW, HW), jnp.float32)   # NCHW like PyTorch
    params = init_params(k_p, in_ch, out_ch)
    packed = pack_params(params)                                  # hoisted out of forward

    out = jax.block_until_ready(down_forward(x, packed, out_ch=out_ch))
    ref = jax.block_until_ready(_reference(x, params))

    assert out.shape == (N, out_ch, HW // 2, HW // 2), out.shape
    max_err = float(jnp.max(jnp.abs(out - ref)))
    assert jnp.allclose(out, ref, rtol=1e-2, atol=2e-2), max_err

    print("KERNEL_OK")
</pallas_src>

<mosaic_0001>
module attributes {stable_mosaic.version = 11 : i64} {
  func.func @down_double_conv_kernel(%arg0: i32, %arg1: memref<1x16x8x8xbf16, #tpu.memory_space<vmem>>, %arg2: memref<36x128xbf16, #tpu.memory_space<vmem>>, %arg3: memref<1x128xf32, #tpu.memory_space<vmem>>, %arg4: memref<1x128xf32, #tpu.memory_space<vmem>>, %arg5: memref<1152x128xbf16, #tpu.memory_space<vmem>>, %arg6: memref<1x128xf32, #tpu.memory_space<vmem>>, %arg7: memref<1x128xf32, #tpu.memory_space<vmem>>, %arg8: memref<1x8x8x128xbf16, #tpu.memory_space<vmem>>, %arg9: memref<10x10x4xbf16, #tpu.memory_space<vmem>>, %arg10: memref<10x10x128xbf16, #tpu.memory_space<vmem>>) attributes {dimension_semantics = [#tpu.dimension_semantics<parallel>], iteration_bounds = array<i64: 2>, scalar_prefetch = 0 : i64, scratch_operands = 2 : i64, tpu.core_type = #tpu.core_type<tc>, window_params = [{transform_indices = @transform_0, window_bounds = array<i64: 1, 16, 8, 8>}, {pipeline_mode = #tpu.pipeline_mode<synchronous>, transform_indices = @transform_1, window_bounds = array<i64: 36, 128>}, {pipeline_mode = #tpu.pipeline_mode<synchronous>, transform_indices = @transform_2, window_bounds = array<i64: 1, 128>}, {pipeline_mode = #tpu.pipeline_mode<synchronous>, transform_indices = @transform_3, window_bounds = array<i64: 1, 128>}, {pipeline_mode = #tpu.pipeline_mode<synchronous>, transform_indices = @transform_4, window_bounds = array<i64: 1152, 128>}, {pipeline_mode = #tpu.pipeline_mode<synchronous>, transform_indices = @transform_5, window_bounds = array<i64: 1, 128>}, {pipeline_mode = #tpu.pipeline_mode<synchronous>, transform_indices = @transform_6, window_bounds = array<i64: 1, 128>}, {transform_indices = @transform_7, window_bounds = array<i64: 1, 8, 8, 128>}]} {
    %c0 = arith.constant 0 : index
    %c0_0 = arith.constant 0 : index
    %c0_1 = arith.constant 0 : index
    %c0_2 = arith.constant 0 : index
    %0 = vector.load %arg1[%c0, %c0_0, %c0_1, %c0_2] : memref<1x16x8x8xbf16, #tpu.memory_space<vmem>>, vector<1x16x8x8xbf16>
    %1 = vector.shape_cast %0 : vector<1x16x8x8xbf16> to vector<16x8x8xbf16>
    %2 = vector.extract_strided_slice %1 {offsets = [0, 0, 0], sizes = [16, 8, 4], strides = [1, 1, 1]} : vector<16x8x8xbf16> to vector<16x8x4xbf16>
    %3 = vector.extract_strided_slice %1 {offsets = [0, 0, 4], sizes = [16, 8, 4], strides = [1, 1, 1]} : vector<16x8x8xbf16> to vector<16x8x4xbf16>
    %4 = arith.maximumf %2, %3 : vector<16x8x4xbf16>
    %5 = vector.shape_cast %4 : vector<16x8x4xbf16> to vector<8x2x8x4xbf16>
    %6 = vector.extract_strided_slice %5 {offsets = [0, 0, 0, 0], sizes = [8, 1, 8, 4], strides = [1, 1, 1, 1]} : vector<8x2x8x4xbf16> to vector<8x1x8x4xbf16>
    %7 = vector.shape_cast %6 : vector<8x1x8x4xbf16> to vector<8x8x4xbf16>
    %8 = vector.extract_strided_slice %5 {offsets = [0, 1, 0, 0], sizes = [8, 1, 8, 4], strides = [1, 1, 1, 1]} : vector<8x2x8x4xbf16> to vector<8x1x8x4xbf16>
    %9 = vector.shape_cast %8 : vector<8x1x8x4xbf16> to vector<8x8x4xbf16>
    %10 = arith.maximumf %7, %9 : vector<8x8x4xbf16>
    %cst = arith.constant 0.000000e+00 : bf16
    %11 = vector.broadcast %cst : bf16 to vector<1x10x4xbf16>
    %c0_3 = arith.constant 0 : index
    %c0_4 = arith.constant 0 : index
    %c0_5 = arith.constant 0 : index
    %12 = vector.load %arg9[%c0_3, %c0_4, %c0_5] : memref<10x10x4xbf16, #tpu.memory_space<vmem>>, vector<1x10x4xbf16>
    tpu.vector_store %arg9[%c0_3, %c0_4, %c0_5], %11 {strides = array<i32>} : memref<10x10x4xbf16, #tpu.memory_space<vmem>>, vector<1x10x4xbf16>,
    %c9 = arith.constant 9 : index
    %c0_6 = arith.constant 0 : index
    %c0_7 = arith.constant 0 : index
    %13 = vector.load %arg9[%c9, %c0_6, %c0_7] : memref<10x10x4xbf16, #tpu.memory_space<vmem>>, vector<1x10x4xbf16>
    tpu.vector_store %arg9[%c9, %c0_6, %c0_7], %11 {strides = array<i32>} : memref<10x10x4xbf16, #tpu.memory_space<vmem>>, vector<1x10x4xbf16>,
    %cst_8 = arith.constant 0.000000e+00 : bf16
    %14 = vector.broadcast %cst_8 : bf16 to vector<8x1x4xbf16>
    %15 = tpu.concatenate %14, %10, %14 in 1 : vector<8x1x4xbf16>, vector<8x8x4xbf16>, vector<8x1x4xbf16> -> vector<8x10x4xbf16>
    %c1 = arith.constant 1 : index
    %c0_9 = arith.constant 0 : index
    %c0_10 = arith.constant 0 : index
    %16 = vector.load %arg9[%c1, %c0_9, %c0_10] : memref<10x10x4xbf16, #tpu.memory_space<vmem>>, vector<8x10x4xbf16>
    tpu.vector_store %arg9[%c1, %c0_9, %c0_10], %15 {strides = array<i32>} : memref<10x10x4xbf16, #tpu.memory_space<vmem>>, vector<8x10x4xbf16>,
    %c0_11 = arith.constant 0 : index
    %c0_12 = arith.constant 0 : index
    %c0_13 = arith.constant 0 : index
    %17 = vector.load %arg9[%c0_11, %c0_12, %c0_13] : memref<10x10x4xbf16, #tpu.memory_space<vmem>>, vector<8x8x4xbf16>
    %c0_14 = arith.constant 0 : index
    %c1_15 = arith.constant 1 : index
    %c0_16 = arith.constant 0 : index
    %18 = vector.load %arg9[%c0_14, %c1_15, %c0_16] : memref<10x10x4xbf16, #tpu.memory_space<vmem>>, vector<8x8x4xbf16>
    %c0_17 = arith.constant 0 : index
    %c2 = arith.constant 2 : index
    %c0_18 = arith.constant 0 : index
    %19 = vector.load %arg9[%c0_17, %c2, %c0_18] : memref<10x10x4xbf16, #tpu.memory_space<vmem>>, vector<8x8x4xbf16>
    %c1_19 = arith.constant 1 : index
    %c0_20 = arith.constant 0 : index
    %c0_21 = arith.constant 0 : index
    %20 = vector.load %arg9[%c1_19, %c0_20, %c0_21] : memref<10x10x4xbf16, #tpu.memory_space<vmem>>, vector<8x8x4xbf16>
    %c1_22 = arith.constant 1 : index
    %c1_23 = arith.constant 1 : index
    %c0_24 = arith.constant 0 : index
    %21 = vector.load %arg9[%c1_22, %c1_23, %c0_24] : memref<10x10x4xbf16, #tpu.memory_space<vmem>>, vector<8x8x4xbf16>
    %c1_25 = arith.constant 1 : index
    %c2_26 = arith.constant 2 : index
    %c0_27 = arith.constant 0 : index
    %22 = vector.load %arg9[%c1_25, %c2_26, %c0_27] : memref<10x10x4xbf16, #tpu.memory_space<vmem>>, vector<8x8x4xbf16>
    %c2_28 = arith.constant 2 : index
    %c0_29 = arith.constant 0 : index
    %c0_30 = arith.constant 0 : index
    %23 = vector.load %arg9[%c2_28, %c0_29, %c0_30] : memref<10x10x4xbf16, #tpu.memory_space<vmem>>, vector<8x8x4xbf16>
    %c2_31 = arith.constant 2 : index
    %c1_32 = arith.constant 1 : index
    %c0_33 = arith.constant 0 : index
    %24 = vector.load %arg9[%c2_31, %c1_32, %c0_33] : memref<10x10x4xbf16, #tpu.memory_space<vmem>>, vector<8x8x4xbf16>
    %c2_34 = arith.constant 2 : index
    %c2_35 = arith.constant 2 : index
    %c0_36 = arith.constant 0 : index
    %25 = vector.load %arg9[%c2_34, %c2_35, %c0_36] : memref<10x10x4xbf16, #tpu.memory_space<vmem>>, vector<8x8x4xbf16>
    %26 = tpu.concatenate %17, %18, %19, %20, %21, %22, %23, %24, %25 in 2 : vector<8x8x4xbf16>, vector<8x8x4xbf16>, vector<8x8x4xbf16>, vector<8x8x4xbf16>, vector<8x8x4xbf16>, vector<8x8x4xbf16>, vector<8x8x4xbf16>, vector<8x8x4xbf16>, vector<8x8x4xbf16> -> vector<8x8x36xbf16>
    %c0_37 = arith.constant 0 : index
    %c0_38 = arith.constant 0 : index
    %27 = vector.load %arg2[%c0_37, %c0_38] : memref<36x128xbf16, #tpu.memory_space<vmem>>, vector<36x128xbf16>
    %cst_39 = arith.constant dense<0.000000e+00> : vector<8x8x128xf32>
    %28 = tpu.matmul %26, %27, %cst_39 {dimension_numbers = #tpu.dot_dimension_numbers<[2], [0], [0, 1], [1], [0, 0, 0, 1, 1, 1], [], []>} : vector<8x8x36xbf16>, vector<36x128xbf16>, vector<8x8x128xf32> -> vector<8x8x128xf32>
    %c0_40 = arith.constant 0 : index
    %c0_41 = arith.constant 0 : index
    %29 = vector.load %arg3[%c0_40, %c0_41] : memref<1x128xf32, #tpu.memory_space<vmem>>, vector<1x128xf32>
    %30 = vector.shape_cast %29 : vector<1x128xf32> to vector<1x1x128xf32>
    %31 = vector.broadcast %30 : vector<1x1x128xf32> to vector<8x8x128xf32>
    %32 = arith.mulf %28, %31 : vector<8x8x128xf32>
    %c0_42 = arith.constant 0 : index
    %c0_43 = arith.constant 0 : index
    %33 = vector.load %arg4[%c0_42, %c0_43] : memref<1x128xf32, #tpu.memory_space<vmem>>, vector<1x128xf32>
    %34 = vector.shape_cast %33 : vector<1x128xf32> to vector<1x1x128xf32>
    %35 = vector.broadcast %34 : vector<1x1x128xf32> to vector<8x8x128xf32>
    %36 = arith.addf %32, %35 : vector<8x8x128xf32>
    %cst_44 = arith.constant 0.000000e+00 : f32
    %37 = vector.broadcast %cst_44 : f32 to vector<8x8x128xf32>
    %38 = arith.maximumf %36, %37 : vector<8x8x128xf32>
    %cst_45 = arith.constant 0.000000e+00 : bf16
    %39 = vector.broadcast %cst_45 : bf16 to vector<1x10x128xbf16>
    %c0_46 = arith.constant 0 : index
    %c0_47 = arith.constant 0 : index
    %c0_48 = arith.constant 0 : index
    %40 = vector.load %arg10[%c0_46, %c0_47, %c0_48] : memref<10x10x128xbf16, #tpu.memory_space<vmem>>, vector<1x10x128xbf16>
    tpu.vector_store %arg10[%c0_46, %c0_47, %c0_48], %39 {strides = array<i32>} : memref<10x10x128xbf16, #tpu.memory_space<vmem>>, vector<1x10x128xbf16>,
    %c9_49 = arith.constant 9 : index
    %c0_50 = arith.constant 0 : index
    %c0_51 = arith.constant 0 : index
    %41 = vector.load %arg10[%c9_49, %c0_50, %c0_51] : memref<10x10x128xbf16, #tpu.memory_space<vmem>>, vector<1x10x128xbf16>
    tpu.vector_store %arg10[%c9_49, %c0_50, %c0_51], %39 {strides = array<i32>} : memref<10x10x128xbf16, #tpu.memory_space<vmem>>, vector<1x10x128xbf16>,
    %cst_52 = arith.constant 0.000000e+00 : bf16
    %42 = vector.broadcast %cst_52 : bf16 to vector<8x1x128xbf16>
    %43 = arith.truncf %38 : vector<8x8x128xf32> to vector<8x8x128xbf16>
    %44 = tpu.concatenate %42, %43, %42 in 1 : vector<8x1x128xbf16>, vector<8x8x128xbf16>, vector<8x1x128xbf16> -> vector<8x10x128xbf16>
    %c1_53 = arith.constant 1 : index
    %c0_54 = arith.constant 0 : index
    %c0_55 = arith.constant 0 : index
    %45 = vector.load %arg10[%c1_53, %c0_54, %c0_55] : memref<10x10x128xbf16, #tpu.memory_space<vmem>>, vector<8x10x128xbf16>
    tpu.vector_store %arg10[%c1_53, %c0_54, %c0_55], %44 {strides = array<i32>} : memref<10x10x128xbf16, #tpu.memory_space<vmem>>, vector<8x10x128xbf16>,
    %c0_56 = arith.constant 0 : index
    %c0_57 = arith.constant 0 : index
    %c0_58 = arith.constant 0 : index
    %46 = vector.load %arg10[%c0_56, %c0_57, %c0_58] : memref<10x10x128xbf16, #tpu.memory_space<vmem>>, vector<8x8x128xbf16>
    %c0_59 = arith.constant 0 : index
    %c1_60 = arith.constant 1 : index
    %c0_61 = arith.constant 0 : index
    %47 = vector.load %arg10[%c0_59, %c1_60, %c0_61] : memref<10x10x128xbf16, #tpu.memory_space<vmem>>, vector<8x8x128xbf16>
    %c0_62 = arith.constant 0 : index
    %c2_63 = arith.constant 2 : index
    %c0_64 = arith.constant 0 : index
    %48 = vector.load %arg10[%c0_62, %c2_63, %c0_64] : memref<10x10x128xbf16, #tpu.memory_space<vmem>>, vector<8x8x128xbf16>
    %c1_65 = arith.constant 1 : index
    %c0_66 = arith.constant 0 : index
    %c0_67 = arith.constant 0 : index
    %49 = vector.load %arg10[%c1_65, %c0_66, %c0_67] : memref<10x10x128xbf16, #tpu.memory_space<vmem>>, vector<8x8x128xbf16>
    %c1_68 = arith.constant 1 : index
    %c1_69 = arith.constant 1 : index
    %c0_70 = arith.constant 0 : index
    %50 = vector.load %arg10[%c1_68, %c1_69, %c0_70] : memref<10x10x128xbf16, #tpu.memory_space<vmem>>, vector<8x8x128xbf16>
    %c1_71 = arith.constant 1 : index
    %c2_72 = arith.constant 2 : index
    %c0_73 = arith.constant 0 : index
    %51 = vector.load %arg10[%c1_71, %c2_72, %c0_73] : memref<10x10x128xbf16, #tpu.memory_space<vmem>>, vector<8x8x128xbf16>
    %c2_74 = arith.constant 2 : index
    %c0_75 = arith.constant 0 : index
    %c0_76 = arith.constant 0 : index
    %52 = vector.load %arg10[%c2_74, %c0_75, %c0_76] : memref<10x10x128xbf16, #tpu.memory_space<vmem>>, vector<8x8x128xbf16>
    %c2_77 = arith.constant 2 : index
    %c1_78 = arith.constant 1 : index
    %c0_79 = arith.constant 0 : index
    %53 = vector.load %arg10[%c2_77, %c1_78, %c0_79] : memref<10x10x128xbf16, #tpu.memory_space<vmem>>, vector<8x8x128xbf16>
    %c2_80 = arith.constant 2 : index
    %c2_81 = arith.constant 2 : index
    %c0_82 = arith.constant 0 : index
    %54 = vector.load %arg10[%c2_80, %c2_81, %c0_82] : memref<10x10x128xbf16, #tpu.memory_space<vmem>>, vector<8x8x128xbf16>
    %55 = tpu.concatenate %46, %47, %48, %49, %50, %51, %52, %53, %54 in 2 : vector<8x8x128xbf16>, vector<8x8x128xbf16>, vector<8x8x128xbf16>, vector<8x8x128xbf16>, vector<8x8x128xbf16>, vector<8x8x128xbf16>, vector<8x8x128xbf16>, vector<8x8x128xbf16>, vector<8x8x128xbf16> -> vector<8x8x1152xbf16>
    %c0_83 = arith.constant 0 : index
    %c0_84 = arith.constant 0 : index
    %56 = vector.load %arg5[%c0_83, %c0_84] : memref<1152x128xbf16, #tpu.memory_space<vmem>>, vector<1152x128xbf16>
    %cst_85 = arith.constant dense<0.000000e+00> : vector<8x8x128xf32>
    %57 = tpu.matmul %55, %56, %cst_85 {dimension_numbers = #tpu.dot_dimension_numbers<[2], [0], [0, 1], [1], [0, 0, 0, 1, 1, 1], [], []>} : vector<8x8x1152xbf16>, vector<1152x128xbf16>, vector<8x8x128xf32> -> vector<8x8x128xf32>
    %c0_86 = arith.constant 0 : index
    %c0_87 = arith.constant 0 : index
    %58 = vector.load %arg6[%c0_86, %c0_87] : memref<1x128xf32, #tpu.memory_space<vmem>>, vector<1x128xf32>
    %59 = vector.shape_cast %58 : vector<1x128xf32> to vector<1x1x128xf32>
    %60 = vector.broadcast %59 : vector<1x1x128xf32> to vector<8x8x128xf32>
    %61 = arith.mulf %57, %60 : vector<8x8x128xf32>
    %c0_88 = arith.constant 0 : index
    %c0_89 = arith.constant 0 : index
    %62 = vector.load %arg7[%c0_88, %c0_89] : memref<1x128xf32, #tpu.memory_space<vmem>>, vector<1x128xf32>
    %63 = vector.shape_cast %62 : vector<1x128xf32> to vector<1x1x128xf32>
    %64 = vector.broadcast %63 : vector<1x1x128xf32> to vector<8x8x128xf32>
    %65 = arith.addf %61, %64 : vector<8x8x128xf32>
    %cst_90 = arith.constant 0.000000e+00 : f32
    %66 = vector.broadcast %cst_90 : f32 to vector<8x8x128xf32>
    %67 = arith.maximumf %65, %66 : vector<8x8x128xf32>
    %68 = vector.shape_cast %67 : vector<8x8x128xf32> to vector<1x8x8x128xf32>
    %69 = arith.truncf %68 : vector<1x8x8x128xf32> to vector<1x8x8x128xbf16>
    %c0_91 = arith.constant 0 : index
    %c0_92 = arith.constant 0 : index
    %c0_93 = arith.constant 0 : index
    %c0_94 = arith.constant 0 : index
    %70 = vector.load %arg8[%c0_91, %c0_92, %c0_93, %c0_94] : memref<1x8x8x128xbf16, #tpu.memory_space<vmem>>, vector<1x8x8x128xbf16>
    tpu.vector_store %arg8[%c0_91, %c0_92, %c0_93, %c0_94], %69 {strides = array<i32>} : memref<1x8x8x128xbf16, #tpu.memory_space<vmem>>, vector<1x8x8x128xbf16>,
    return
  }
  func.func @transform_0(%arg0: i32) -> (i32, i32, i32, i32) {
    %c0_i32 = arith.constant 0 : i32
    %c0_i32_0 = arith.constant 0 : i32
    %c0_i32_1 = arith.constant 0 : i32
    %c0_i32_2 = arith.constant 0 : i32
    return %arg0, %c0_i32, %c0_i32_0, %c0_i32_1 : i32, i32, i32, i32
  }
  func.func @transform_1(%arg0: i32) -> (i32, i32) {
    %c0_i32 = arith.constant 0 : i32
    %c0_i32_0 = arith.constant 0 : i32
    %c0_i32_1 = arith.constant 0 : i32
    return %c0_i32, %c0_i32_0 : i32, i32
  }
  func.func @transform_2(%arg0: i32) -> (i32, i32) {
    %c0_i32 = arith.constant 0 : i32
    %c0_i32_0 = arith.constant 0 : i32
    %c0_i32_1 = arith.constant 0 : i32
    return %c0_i32, %c0_i32_0 : i32, i32
  }
  func.func @transform_3(%arg0: i32) -> (i32, i32) {
    %c0_i32 = arith.constant 0 : i32
    %c0_i32_0 = arith.constant 0 : i32
    %c0_i32_1 = arith.constant 0 : i32
    return %c0_i32, %c0_i32_0 : i32, i32
  }
  func.func @transform_4(%arg0: i32) -> (i32, i32) {
    %c0_i32 = arith.constant 0 : i32
    %c0_i32_0 = arith.constant 0 : i32
    %c0_i32_1 = arith.constant 0 : i32
    return %c0_i32, %c0_i32_0 : i32, i32
  }
  func.func @transform_5(%arg0: i32) -> (i32, i32) {
    %c0_i32 = arith.constant 0 : i32
    %c0_i32_0 = arith.constant 0 : i32
    %c0_i32_1 = arith.constant 0 : i32
    return %c0_i32, %c0_i32_0 : i32, i32
  }
  func.func @transform_6(%arg0: i32) -> (i32, i32) {
    %c0_i32 = arith.constant 0 : i32
    %c0_i32_0 = arith.constant 0 : i32
    %c0_i32_1 = arith.constant 0 : i32
    return %c0_i32, %c0_i32_0 : i32, i32
  }
  func.func @transform_7(%arg0: i32) -> (i32, i32, i32, i32) {
    %c0_i32 = arith.constant 0 : i32
    %c0_i32_0 = arith.constant 0 : i32
    %c0_i32_1 = arith.constant 0 : i32
    %c0_i32_2 = arith.constant 0 : i32
    return %arg0, %c0_i32, %c0_i32_0, %c0_i32_1 : i32, i32, i32, i32
  }
}

</mosaic_0001>

<bundles_post_ra>
// kernel: down_forward.1
= control target key start
LH: loop header
LB: loop body
LE: loop exit
PB: predicated region body
PF: predicated region fallthrough
CT: control target
= control target key end

     0   :  { %12 = vsyncpa [#allocation5], 0  ;;  %s4113_s24 = smov 0   ;;  %s4955_s0 = inlined_call_operand.vmem [shape: bf16[2,16,8,8], index: 0, kind: input, shape index: {}]   ;;  %s4956_s1 = inlined_call_operand.vmem [shape: bf16[36,128], index: 1, kind: input, shape index: {}]   ;;  %s4957_s2 = inlined_call_operand.vmem [shape: f32[1,128], index: 2, kind: input, shape index: {}]   ;;  %s4958_s3 = inlined_call_operand.vmem [shape: f32[1,128], index: 3, kind: input, shape index: {}]   ;;  %s4959_s4 = inlined_call_operand.hbm [shape: bf16[1152,128], index: 4, kind: input, shape index: {}]   ;;  %s4960_s5 = inlined_call_operand.vmem [shape: f32[1,128], index: 5, kind: input, shape index: {}]   ;;  %s4961_s6 = inlined_call_operand.vmem [shape: f32[1,128], index: 6, kind: input, shape index: {}]   ;;  %s4962_s7 = inlined_call_operand.vmem [shape: bf16[2,8,8,128], index: 7, kind: output, shape index: {}]  }
   0x1 LB: > { %s4119_s25 = sadd.s32 4294967295, %s4058_s24   ;;  %p3261_p0 = scmp.ge.s32.totalorder %s4058_s24, 1  ;;  %s4058_s24 = sphi %s4113_s24, %s18_s24  }
   0x2   : > { %p201_p1 = scmp.lt.s32.totalorder %s4058_s24, 3  ;;  %s4060_s26 = smov [#allocation4]  }
   0x3   : > { %s222_s27 = sshll.u32 %s4060_s26, 4  ;;  %p4963_p3 = scmp.eq.s32.totalorder %s4119_s25, 0  ;;  %s223_s27 = int_to_ptr.vmem [resolvable:$true] %s222_s27 }
   0x4   : > { %p4123_p2 = pnand %p3261_p0, %p201_p1  ;;  %s4020_s9 = scalar_lea.hbm %s4959_s4, 9216 }
   0x5   : > { %p4021_p6 = scmp.ne.s32.totalorder %s4959_s4, %s4020_s9  ;;  %p4027_p10 = scmp.lt.u32.totalorder %s4020_s9, %s4959_s4 }
   0x6   : > { %s4965_s28 = scalar_select %p4123_p2, 1, 0 }
   0x7   : > { %p3794_p4 = pneg %p4123_p2 }
   0x9   : > { %p4132_p5 = pnand %p4963_p3, %p3794_p4 }
   0xb   : > { %p4022_p7 = pneg %p4132_p5 }
   0xd   : > { %p4023_p8 = pnand %p4022_p7, %p4021_p6 }
   0xf   : > { %p4024_p9 = pneg %p4023_p8 }
  0x11   : > { %p4029_p11 = pnand %p4027_p10, %p4024_p9 }
  0x13   : > { %4032 = shalt.err (!%p4029_p11)
}
  0x14   : > { %s4033_s14 = scalar_lea.vmem %s223_s27, 9216  ;;  %p4041_p1 = scmp.lt.s32.totalorder %s223_s27, %s223_s27 }
  0x15   : > { %p4034_p12 = scmp.ne.s32.totalorder %s223_s27, %s4033_s14  ;;  %p4042_p4 = scmp.lt.s32.totalorder %s4033_s14, %s4033_s14 }
  0x17   : > { %p4036_p13 = pnand %p4034_p12, %p4022_p7  ;;  %p4043_p3 = por %p4042_p4, %p4041_p1 }
  0x19   : > { %p4037_p0 = pneg %p4036_p13 }
  0x1b   : > { %p4044_p2 = pnand %p4043_p3, %p4037_p0 }
  0x1d   : > { %4047 = shalt.err (!%p4044_p2)
}
  0x1e   : > { %s4061_s15 = smov 64   ;;  %s4062_s16 = smov 4  }
  0x1f   : > { %3797 = dma.hbm_to_vmem [thread:$0]  (!%p4132_p5), %s4959_s4, 9216, %s223_s27, [#allocation5], %s4061_s15, %s4061_s15, %s4062_s16  }
  0x20   : > { %p4967_p6 = scmp.ne.s32.totalorder %s4965_s28, 0 }
  0x21   : > { %p4968_p8 = scmp.eq.s32.totalorder (!%p4967_p6), %s4119_s25, 0 }
  0x22   : > { %252 = sbr.rel (%p4967_p6) target bundleno = 967 (0x3c7), region = 48 }
  0x29   : > { %4053 = dma.done.wait (%p4968_p8), [#allocation5], 9216   ;;  %p4969_p7 = pmov %p4968_p8 }
  0x2a   : > { %p284_p2 = scmp.lt.s32.totalorder %s4119_s25, 1  ;;  %vm399_vm0 = vcmask 27648   ;;  %vm401_vm1 = vcmask 24576   ;;  %v4063_v0 = vmov 0   ;;  %s4064_s23 = smov 124   ;;  %vm494_vm2 = vcmask 1040384  }
  0x2b   : > { %4055 = vsyncadd (%p4969_p7), [#allocation5], 4294958080  ;;  %404 = vst.msk [vmem:[#allocation2 + $0x48] sm:$0xf] %vm399_vm0, %v4063_v0  ;;  %s4065_s26 = smov 24   ;;  %s4066_s27 = smov 4  }
  0x2c   : > { %s4975_s25 = smov (!%p284_p2, %s4119_s25), 1  ;;  %405 = vst.msk [vmem:[#allocation2 + $0x4c] sm:$0x1] %vm401_vm1, %v4063_v0  ;;  %402 = vst.msk [vmem:[#allocation2 + $0x4] sm:$0x1] %vm401_vm1, %v4063_v0  ;;  %s4067_s28 = smov 28  }
  0x2d   : > { %400 = vst.msk [vmem:[#allocation2] sm:$0xf] %vm399_vm0, %v4063_v0  ;;  %1494 = vst [vmem:[#allocation3] sm:$0xf] %v4063_v0  ;;  %s3547_s19 = sshll.u32 %s4975_s25, 6  ;;  %s4068_s29 = smov 8  }
  0x2e   : > { %1495 = vst [vmem:[#allocation3 + $0x4] sm:$0x1] %v4063_v0  ;;  %1497 = vst [vmem:[#allocation3 + $0x48] sm:$0xf] %v4063_v0  ;;  %s4170_s22 = scalar_lea.vmem %s4955_s0, %s3547_s19  ;;  %vm495_vm3 = vsmask.f32 256 }
  0x2f   : > { %1498 = vst [vmem:[#allocation3 + $0x4c] sm:$0x1] %v4063_v0  ;;  %v4173_v1 = vld [vmem:[%s4170_s22 + $0x8] sm:$0xf]  ;;  %v4176_v2 = vld [vmem:[%s4170_s22] sm:$0xf]  ;;  %vm4265_vm6 = vmand %vm494_vm2, %vm495_vm3 }
  0x30   : > { %331 = vrot.lane.b32.xlu1 %v4173_v1, %s4064_s23  ;;  %327 = vrot.lane.b32.xlu0 %v4176_v2, %s4064_s23  ;;  %v4183_v3 = vld [vmem:[%s4170_s22 + $0xc] sm:$0xf]  ;;  %v4186_v4 = vld [vmem:[%s4170_s22 + $0x4] sm:$0xf]  ;;  %vm505_vm4 = vcmask 1044480   ;;  %s4069_s30 = smov 12  }
  0x31   : > { %v4193_v5 = vld [vmem:[%s4170_s22 + $0x14] sm:$0xf]  ;;  %v4196_v6 = vld [vmem:[%s4170_s22 + $0x10] sm:$0xf]  ;;  %v4199_v12 = vld [vmem:[%s4170_s22 + $0x1c] sm:$0xf] }
  0x32   : > { %v645_v9 = vld [vmem:[#allocation2 + $0x48] sm:$0xf]  ;;  %v4206_v15 = vld [vmem:[%s4170_s22 + $0x18] sm:$0xf]  ;;  %v4209_v19 = vld [vmem:[%s4170_s22 + $0x24] sm:$0xf] }
  0x33   : > { %v597_v8 = vld [vmem:[#allocation2 + $0x4] sm:$0x1]  ;;  %v653_v10 = vld [vmem:[#allocation2 + $0x4c] sm:$0x1]  ;;  %v4212_v20 = vld [vmem:[%s4170_s22 + $0x20] sm:$0xf]  ;;  %v3341_v32 = vcombine.low %v645_v9, %v645_v9 }
  0x34   : > { %333 = vrot.lane.b32.xlu1 %v4183_v3, %s4064_s23  ;;  %329 = vrot.lane.b32.xlu0 %v4186_v4, %s4064_s23  ;;  %v589_v7 = vld [vmem:[#allocation2] sm:$0xf]  ;;  %v3349_v13 = vcombine.low %v645_v9, %v653_v10  ;;  %v4219_v26 = vld [vmem:[%s4170_s22 + $0x2c] sm:$0xf]  ;;  %v4222_v27 = vld [vmem:[%s4170_s22 + $0x28] sm:$0xf] }
  0x35   : > { %v3294_v11 = vcombine.low %v589_v7, %v597_v8  ;;  %v605_v18 = vld [vmem:[#allocation2] sm:$0xe]  ;;  %v4229_v28 = vld [vmem:[%s4170_s22 + $0x34] sm:$0xf]  ;;  %v4232_v29 = vld [vmem:[%s4170_s22 + $0x30] sm:$0xf] }
  0x36   : > { %v1122_v17 = vshll.u32 %v3349_v13, 16  ;;  %v3302_v22 = vcombine.low %v605_v18, %v597_v8  ;;  %v1120_v23 = vshrl.u32 %v3349_v13, 16  ;;  %v4239_v30 = vld [vmem:[%s4170_s22 + $0x3c] sm:$0xf]  ;;  %v4242_v31 = vld [vmem:[%s4170_s22 + $0x38] sm:$0xf] }
  0x37   : > { %v705_v14 = vshll.u32 %v3294_v11, 16  ;;  %v703_v16 = vshrl.u32 %v3294_v11, 16  ;;  %vm506_vm5 = vsmask.f32 4352  ;;  %s4070_s8 = smov 20   ;;  %s4071_s9 = smov 32  }
  0x38   : > { %337 = vrot.lane.b32.xlu1 %v4193_v5, %s4064_s23  ;;  %335 = vrot.lane.b32.xlu0 %v4196_v6, %s4064_s23  ;;  %v1124_v24 = vrot.slane %v1122_v17, 1  ;;  %v798_v25 = vrot.slane %v3302_v22, 1  ;;  %vm4270_vm7 = vmand %vm505_vm4, %vm506_vm5  ;;  %s4072_s10 = smov 16   ;;  %vm1387_vm8 = vcmask 1041408   ;;  %vm1190_vm9 = vcmask 31744  }
  0x39   : > { %v707_v21 = vrot.slane %v705_v14, 1  ;;  %vm1215_vm10 = vcmask 64512   ;;  %vm1232_vm11 = vcmask 97280   ;;  %vm1249_vm12 = vcmask 130048  }
  0x3a   : > { %v1125_v34 = vor.u32 %v1124_v24, %v1120_v23  ;;  %vm1266_vm13 = vcmask 162816   ;;  %vm1283_vm14 = vcmask 195584   ;;  %vm1300_vm15 = vcmask 228352  }
  0x3b   : > { %v708_v33 = vor.u32 %v707_v21, %v703_v16 }
  0x3c   : > { %341 = vrot.lane.b32.xlu1 %v4199_v12, %s4064_s23  ;;  %339 = vrot.lane.b32.xlu0 %v4206_v15, %s4064_s23 }
  0x40   : > { %345 = vrot.lane.b32.xlu1 %v4209_v19, %s4064_s23  ;;  %343 = vrot.lane.b32.xlu0 %v4212_v20, %s4064_s23 }
  0x44   : > { %349 = vrot.lane.b32.xlu1 %v4219_v26, %s4064_s23  ;;  %347 = vrot.lane.b32.xlu0 %v4222_v27, %s4064_s23 }
  0x48   : > { %353 = vrot.lane.b32.xlu1 %v4229_v28, %s4064_s23  ;;  %351 = vrot.lane.b32.xlu0 %v4232_v29, %s4064_s23 }
  0x4c   : > { %357 = vrot.lane.b32.xlu1 %v4239_v30, %s4064_s23  ;;  %355 = vrot.lane.b32.xlu0 %v4242_v31, %s4064_s23 }
  0x50   : > { %1044 = vrot.lane.b32.xlu1 %v3341_v32, %s4065_s26  ;;  %758 = vrot.lane.b32.xlu0 %v708_v33, %s4066_s27 }
  0x54   : > { %1140 = vrot.lane.b32.xlu1 %v1125_v34, %s4067_s28  ;;  %806 = vrot.lane.b32.xlu0 %v798_v25, %s4068_s29 }
  0xa2   : > { %v332_v35 = vpop.permute.xlu1 %331  ;;  %v328_v36 = vpop.permute.xlu0 %327 }
  0xa3   : > { %v377_v39 = vmax.bf16 %v332_v35, %v4173_v1  ;;  %v375_v40 = vmax.bf16 %v328_v36, %v4176_v2 }
  0xa6   : > { %v334_v37 = vpop.permute.xlu1 %333  ;;  %v330_v38 = vpop.permute.xlu0 %329 }
  0xa7   : > { %v378_v41 = vmax.bf16 %v334_v37, %v4183_v3  ;;  %v376_v42 = vmax.bf16 %v330_v38, %v4186_v4 }
  0xa9   : > { %v392_v43 = vmax.bf16 %v378_v41, %v377_v39  ;;  %v391_v44 = vmax.bf16 %v376_v42, %v375_v40 }
  0xaa   : > { %v338_v45 = vpop.permute.xlu1 %337  ;;  %v336_v46 = vpop.permute.xlu0 %335 }
  0xab   : > { %v3271_v47 = vcombine.low %v392_v43, %v392_v43  ;;  %v3270_v48 = vcombine.low %v391_v44, %v391_v44  ;;  %v380_v49 = vmax.bf16 %v338_v45, %v4193_v5  ;;  %v379_v50 = vmax.bf16 %v336_v46, %v4196_v6 }
  0xad   : > { %v438_v51 = vshrl.u32 %v3271_v47, 16  ;;  %v431_v52 = vshrl.u32 %v3270_v48, 16  ;;  %v441_v53 = vshll.u32 %v3271_v47, 16  ;;  %v434_v54 = vshll.u32 %v3270_v48, 16 }
  0xae   : > { %v393_v55 = vmax.bf16 %v380_v49, %v379_v50  ;;  %v342_v56 = vpop.permute.xlu1 %341  ;;  %v340_v57 = vpop.permute.xlu0 %339 }
  0xaf   : > { %v440_v58 = vrot.slane %v438_v51, 7  ;;  %v433_v59 = vrot.slane %v431_v52, 7  ;;  %v382_v60 = vmax.bf16 %v342_v56, %v4199_v12  ;;  %v381_v61 = vmax.bf16 %v340_v57, %v4206_v15 }
  0xb0   : > { %v3272_v63 = vcombine.low %v393_v55, %v393_v55 }
  0xb1   : > { %v443_v1 = vor.u32 %v441_v53, %v440_v58  ;;  %v436_v2 = vor.u32 %v434_v54, %v433_v59  ;;  %v394_v3 = vmax.bf16 %v382_v60, %v381_v61 }
  0xb2   : > { %v445_v4 = vshrl.u32 %v3272_v63, 16  ;;  %v448_v5 = vshll.u32 %v3272_v63, 16  ;;  %v346_v6 = vpop.permute.xlu1 %345  ;;  %v344_v7 = vpop.permute.xlu0 %343 }
  0xb3   : > { %v498_v8 = vsel %vm4265_vm6, 0, %v443_v1  ;;  %v497_v9 = vsel %vm4265_vm6, 0, %v436_v2  ;;  %v3273_v10 = vcombine.low %v394_v3, %v394_v3  ;;  %v384_v11 = vmax.bf16 %v346_v6, %v4209_v19 }
  0xb4   : > { %v509_v12 = vsel %vm4270_vm7, %v498_v8, 0  ;;  %v508_v13 = vsel %vm4270_vm7, %v497_v9, 0  ;;  %v447_v14 = vrot.slane %v445_v4, 7  ;;  %v383_v15 = vmax.bf16 %v344_v7, %v4212_v20 }
  0xb5   : > { %v3280_v16 = vcombine.low %v509_v12, %v509_v12  ;;  %v3281_v17 = vcombine.high %v509_v12, %v509_v12  ;;  %v3278_v18 = vcombine.low %v508_v13, %v508_v13  ;;  %v3279_v21 = vcombine.high %v508_v13, %v508_v13 }
  0xb6   : > { %v450_v22 = vor.u32 %v448_v5, %v447_v14  ;;  %v452_v23 = vshrl.u32 %v3273_v10, 16  ;;  %v395_v24 = vmax.bf16 %v384_v11, %v383_v15  ;;  %v350_v25 = vpop.permute.xlu1 %349  ;;  %v348_v32 = vpop.permute.xlu0 %347  ;;  %v455_v35 = vshll.u32 %v3273_v10, 16 }
  0xb7   : > { %575 = vst.msk [vmem:[#allocation2 + $0x10] sm:$0xf] %vm399_vm0, %v3280_v16  ;;  %573 = vst.msk [vmem:[#allocation2 + $0x8] sm:$0xf] %vm399_vm0, %v3278_v18  ;;  %v386_v19 = vmax.bf16 %v350_v25, %v4219_v26  ;;  %v385_v20 = vmax.bf16 %v348_v32, %v4222_v27 }
  0xb8   : > { %576 = vst.msk [vmem:[#allocation2 + $0x14] sm:$0x1] %vm401_vm1, %v3281_v17  ;;  %574 = vst.msk [vmem:[#allocation2 + $0xc] sm:$0x1] %vm401_vm1, %v3279_v21  ;;  %v499_v33 = vsel %vm4265_vm6, 0, %v450_v22  ;;  %v454_v34 = vrot.slane %v452_v23, 7  ;;  %v3274_v36 = vcombine.low %v395_v24, %v395_v24 }
  0xb9   : > { %v510_v37 = vsel %vm4270_vm7, %v499_v33, 0  ;;  %v396_v38 = vmax.bf16 %v386_v19, %v385_v20 }
  0xba   : > { %v3282_v39 = vcombine.low %v510_v37, %v510_v37  ;;  %v3283_v40 = vcombine.high %v510_v37, %v510_v37  ;;  %v457_v41 = vor.u32 %v455_v35, %v454_v34  ;;  %v459_v42 = vshrl.u32 %v3274_v36, 16  ;;  %v354_v43 = vpop.permute.xlu1 %353  ;;  %v352_v44 = vpop.permute.xlu0 %351 }
  0xbb   : > { %v3275_v45 = vcombine.low %v396_v38, %v396_v38  ;;  %v388_v26 = vmax.bf16 %v354_v43, %v4229_v28  ;;  %v387_v27 = vmax.bf16 %v352_v44, %v4232_v29  ;;  %v462_v48 = vshll.u32 %v3274_v36, 16 }
  0xbc   : > { %577 = vst.msk [vmem:[#allocation2 + $0x18] sm:$0xf] %vm399_vm0, %v3282_v39  ;;  %v500_v46 = vsel %vm4265_vm6, 0, %v457_v41  ;;  %v461_v47 = vrot.slane %v459_v42, 7 }
  0xbd   : > { %578 = vst.msk [vmem:[#allocation2 + $0x1c] sm:$0x1] %vm401_vm1, %v3283_v40  ;;  %v511_v49 = vsel %vm4270_vm7, %v500_v46, 0  ;;  %v466_v50 = vshrl.u32 %v3275_v45, 16  ;;  %v397_v51 = vmax.bf16 %v388_v26, %v387_v27  ;;  %v469_v28 = vshll.u32 %v3275_v45, 16 }
  0xbe   : > { %v3284_v52 = vcombine.low %v511_v49, %v511_v49  ;;  %v3285_v53 = vcombine.high %v511_v49, %v511_v49  ;;  %v464_v54 = vor.u32 %v462_v48, %v461_v47  ;;  %v358_v55 = vpop.permute.xlu1 %357  ;;  %v356_v29 = vpop.permute.xlu0 %355  ;;  %v4302_v56 = vld [vmem:[#allocation2 + $0x10] sm:$0xf]  ;;  %v4304_v57 = vld [vmem:[#allocation2 + $0x8] sm:$0xf] }
  0xbf   : > { %v468_v58 = vrot.slane %v466_v50, 7  ;;  %v3276_v59 = vcombine.low %v397_v51, %v397_v51  ;;  %v390_v60 = vmax.bf16 %v358_v55, %v4239_v30  ;;  %v389_v61 = vmax.bf16 %v356_v29, %v4242_v31  ;;  %v4330_v14 = vld [vmem:[#allocation2 + $0x10] sm:$0xf] }
  0xc0   : > { %579 = vst.msk [vmem:[#allocation2 + $0x20] sm:$0xf] %vm399_vm0, %v3284_v52  ;;  %v501_v63 = vsel %vm4265_vm6, 0, %v464_v54  ;;  %v3311_v1 = vcombine.low %v4302_v56, %v4302_v56  ;;  %v3310_v2 = vcombine.low %v4304_v57, %v4304_v57  ;;  %v3334_v22 = vcombine.low %v4330_v14, %v4330_v14  ;;  %v607_v54 = vld [vmem:[#allocation2 + $0x10] sm:$0xe] }
  0xc1   : > { %580 = vst.msk [vmem:[#allocation2 + $0x24] sm:$0x1] %vm401_vm1, %v3285_v53  ;;  %v512_v3 = vsel %vm4270_vm7, %v501_v63, 0  ;;  %v471_v4 = vor.u32 %v469_v28, %v468_v58  ;;  %v473_v30 = vshrl.u32 %v3276_v59, 16  ;;  %v398_v6 = vmax.bf16 %v390_v60, %v389_v61  ;;  %v4393_v53 = vld [vmem:[#allocation2 + $0x14] sm:$0x1] }
  0xc2   : > { %v3286_v5 = vcombine.low %v512_v3, %v512_v3  ;;  %v3287_v31 = vcombine.high %v512_v3, %v512_v3  ;;  %848 = vrot.lane.b32.xlu1 %v3311_v1, %s4069_s30  ;;  %846 = vrot.lane.b32.xlu0 %v3310_v2, %s4069_s30  ;;  %v476_v9 = vshll.u32 %v3276_v59, 16  ;;  %v4395_v28 = vld [vmem:[#allocation2 + $0xc] sm:$0x1]  ;;  %v606_v58 = vld [vmem:[#allocation2 + $0x8] sm:$0xe]  ;;  %v3304_v61 = vcombine.low %v607_v54, %v4393_v53 }
  0xc3   : > { %v502_v7 = vsel %vm4265_vm6, 0, %v471_v4  ;;  %v475_v8 = vrot.slane %v473_v30, 7  ;;  %v4322_v10 = vld [vmem:[#allocation2 + $0x18] sm:$0xf]  ;;  %v3277_v12 = vcombine.low %v398_v6, %v398_v6  ;;  %v3303_v63 = vcombine.low %v606_v58, %v4395_v28  ;;  %v4409_v1 = vld [vmem:[#allocation2 + $0xc] sm:$0x1] }
  0xc4   : > { %581 = vst.msk [vmem:[#allocation2 + $0x28] sm:$0xf] %vm399_vm0, %v3286_v5  ;;  %v513_v11 = vsel %vm4270_vm7, %v502_v7, 0  ;;  %v3312_v13 = vcombine.low %v4322_v10, %v4322_v10  ;;  %v4347_v35 = vld [vmem:[#allocation2 + $0x18] sm:$0xf]  ;;  %v800_v30 = vrot.slane %v3304_v61, 1 }
  0xc5   : > { %582 = vst.msk [vmem:[#allocation2 + $0x2c] sm:$0x1] %vm401_vm1, %v3287_v31  ;;  %v3288_v15 = vcombine.low %v513_v11, %v513_v11  ;;  %v3289_v16 = vcombine.high %v513_v11, %v513_v11  ;;  %v478_v17 = vor.u32 %v476_v9, %v475_v8  ;;  %v480_v18 = vshrl.u32 %v3277_v12, 16  ;;  %v629_v2 = vld [vmem:[#allocation2 + $0x8] sm:$0xe] }
  0xc6   : > { %850 = vrot.lane.b32.xlu0 %v3312_v13, %s4069_s30  ;;  %v483_v32 = vshll.u32 %v3277_v12, 16  ;;  %v3335_v39 = vcombine.low %v4347_v35, %v4347_v35  ;;  %v4411_v3 = vld [vmem:[#allocation2 + $0x1c] sm:$0x1]  ;;  %v608_v4 = vld [vmem:[#allocation2 + $0x18] sm:$0xe]  ;;  %v799_v5 = vrot.slane %v3303_v63, 1  ;;  %v3326_v31 = vcombine.low %v629_v2, %v4409_v1 }
  0xc7   : > { %583 = vst.msk [vmem:[#allocation2 + $0x30] sm:$0xf] %vm399_vm0, %v3288_v15  ;;  %v503_v21 = vsel %vm4265_vm6, 0, %v478_v17  ;;  %v4339_v23 = vld [vmem:[#allocation2 + $0x20] sm:$0xf]  ;;  %v482_v25 = vrot.slane %v480_v18, 7  ;;  %v3305_v6 = vcombine.low %v608_v4, %v4411_v3 }
  0xc8   : > { %584 = vst.msk [vmem:[#allocation2 + $0x34] sm:$0x1] %vm401_vm1, %v3289_v16  ;;  %v514_v24 = vsel %vm4270_vm7, %v503_v21, 0  ;;  %v3313_v19 = vcombine.low %v4339_v23, %v4339_v23  ;;  %v4345_v34 = vld [vmem:[#allocation2 + $0x20] sm:$0xf]  ;;  %v982_v12 = vrot.slane %v3326_v31, 1 }
  0xc9   : > { %v3290_v20 = vcombine.low %v514_v24, %v514_v24  ;;  %v3291_v33 = vcombine.high %v514_v24, %v514_v24  ;;  %v485_v36 = vor.u32 %v483_v32, %v482_v25  ;;  %v3336_v38 = vcombine.low %v4345_v34, %v4345_v34  ;;  %v4417_v7 = vld [vmem:[#allocation2 + $0x1c] sm:$0x1]  ;;  %v631_v8 = vld [vmem:[#allocation2 + $0x18] sm:$0xe]  ;;  %v4419_v9 = vld [vmem:[#allocation2 + $0x14] sm:$0x1] }
  0xca   : > { %1030 = vrot.lane.b32.xlu0 %v3334_v22, %s4065_s26  ;;  %852 = vrot.lane.b32.xlu1 %v3313_v19, %s4069_s30  ;;  %v630_v11 = vld [vmem:[#allocation2 + $0x10] sm:$0xe]  ;;  %v801_v13 = vrot.slane %v3305_v6, 1  ;;  %v3328_v15 = vcombine.low %v631_v8, %v4417_v7  ;;  %v4425_v17 = vld [vmem:[#allocation2 + $0x14] sm:$0x1] }
  0xcb   : > { %585 = vst.msk [vmem:[#allocation2 + $0x38] sm:$0xf] %vm399_vm0, %v3290_v20  ;;  %v504_v37 = vsel %vm4265_vm6, 0, %v485_v36  ;;  %v4361_v41 = vld [vmem:[#allocation2 + $0x28] sm:$0xf]  ;;  %v3327_v16 = vcombine.low %v630_v11, %v4419_v9 }
  0xcc   : > { %586 = vst.msk [vmem:[#allocation2 + $0x3c] sm:$0x1] %vm401_vm1, %v3291_v33  ;;  %v515_v40 = vsel %vm4270_vm7, %v504_v37, 0  ;;  %v4363_v42 = vld [vmem:[#allocation2 + $0x28] sm:$0xf]  ;;  %v3337_v45 = vcombine.low %v4361_v41, %v4361_v41  ;;  %v984_v24 = vrot.slane %v3328_v15, 1 }
  0xcd   : > { %v3292_v43 = vcombine.low %v515_v40, %v515_v40  ;;  %v3293_v44 = vcombine.high %v515_v40, %v515_v40  ;;  %v3314_v26 = vcombine.low %v4363_v42, %v4363_v42  ;;  %v654_v18 = vld [vmem:[#allocation2 + $0x10] sm:$0xe]  ;;  %v4427_v21 = vld [vmem:[#allocation2 + $0x24] sm:$0x1]  ;;  %v632_v22 = vld [vmem:[#allocation2 + $0x20] sm:$0xe] }
  0xce   : > { %1034 = vrot.lane.b32.xlu0 %v3336_v38, %s4065_s26  ;;  %1032 = vrot.lane.b32.xlu1 %v3335_v39, %s4065_s26  ;;  %v4373_v27 = vld [vmem:[#allocation2 + $0x30] sm:$0xf]  ;;  %v983_v25 = vrot.slane %v3327_v16, 1  ;;  %v3350_v32 = vcombine.low %v654_v18, %v4425_v17  ;;  %v3329_v19 = vcombine.low %v632_v22, %v4427_v21  ;;  %v4433_v20 = vld [vmem:[#allocation2 + $0x24] sm:$0x1] }
  0xcf   : > { %587 = vst.msk [vmem:[#allocation2 + $0x40] sm:$0xf] %vm399_vm0, %v3292_v43  ;;  %v3315_v48 = vcombine.low %v4373_v27, %v4373_v27  ;;  %v4383_v49 = vld [vmem:[#allocation2 + $0x30] sm:$0xf]  ;;  %v656_v33 = vld [vmem:[#allocation2 + $0x20] sm:$0xe] }
  0xd0   : > { %588 = vst.msk [vmem:[#allocation2 + $0x44] sm:$0x1] %vm401_vm1, %v3293_v44  ;;  %v3338_v51 = vcombine.low %v4383_v49, %v4383_v49  ;;  %v4435_v36 = vld [vmem:[#allocation2 + $0x1c] sm:$0x1]  ;;  %v655_v37 = vld [vmem:[#allocation2 + $0x18] sm:$0xe]  ;;  %v3352_v40 = vcombine.low %v656_v33, %v4433_v20 }
  0xd1   : > { %v1166_v38 = vrot.slane %v3350_v32, 1  ;;  %v985_v39 = vrot.slane %v3329_v19, 1  ;;  %v3351_v43 = vcombine.low %v655_v37, %v4435_v36  ;;  %v4441_v44 = vld [vmem:[#allocation2 + $0x24] sm:$0x1]  ;;  %v4449_v58 = vld [vmem:[#allocation2 + $0x34] sm:$0x1] }
  0xd2   : > { %1036 = vrot.lane.b32.xlu1 %v3337_v45, %s4065_s26  ;;  %854 = vrot.lane.b32.xlu0 %v3314_v26, %s4069_s30  ;;  %v4377_v46 = vld [vmem:[#allocation2 + $0x38] sm:$0xf]  ;;  %v609_v45 = vld [vmem:[#allocation2 + $0x20] sm:$0xe]  ;;  %v4443_v26 = vld [vmem:[#allocation2 + $0x2c] sm:$0x1] }
  0xd3   : > { %v3316_v47 = vcombine.low %v4377_v46, %v4377_v46  ;;  %v4399_v29 = vld [vmem:[#allocation2 + $0x38] sm:$0xf]  ;;  %v610_v61 = vld [vmem:[#allocation2 + $0x28] sm:$0xe]  ;;  %v4459_v6 = vld [vmem:[#allocation2 + $0x3c] sm:$0x1] }
  0xd4   : > { %v3339_v60 = vcombine.low %v4399_v29, %v4399_v29  ;;  %v633_v31 = vld [vmem:[#allocation2 + $0x28] sm:$0xe]  ;;  %v612_v8 = vld [vmem:[#allocation2 + $0x38] sm:$0xe]  ;;  %v4463_v11 = vld [vmem:[#allocation2 + $0x10] sm:$0xf] }
  0xd5   : > { %v3309_v16 = vcombine.low %v612_v8, %v4459_v6  ;;  %v4467_v18 = vld [vmem:[#allocation2 + $0x3c] sm:$0x1]  ;;  %v635_v22 = vld [vmem:[#allocation2 + $0x38] sm:$0xe]  ;;  %v3296_v32 = vcombine.low %v4463_v11, %v4393_v53  ;;  %v4475_v19 = vld [vmem:[#allocation2 + $0x8] sm:$0xf] }
  0xd6   : > { %856 = vrot.lane.b32.xlu1 %v3315_v48, %s4069_s30  ;;  %858 = vrot.lane.b32.xlu0 %v3316_v47, %s4069_s30  ;;  %v4387_v50 = vld [vmem:[#allocation2 + $0x40] sm:$0xf]  ;;  %v657_v47 = vld [vmem:[#allocation2 + $0x28] sm:$0xe]  ;;  %v1168_v48 = vrot.slane %v3352_v40, 1  ;;  %v3295_v53 = vcombine.low %v4475_v19, %v4395_v28  ;;  %vm1317_vm0 = vcmask 261120  }
  0xd7   : > { %v3317_v52 = vcombine.low %v4387_v50, %v4387_v50  ;;  %v4397_v55 = vld [vmem:[#allocation2 + $0x40] sm:$0xf]  ;;  %v3353_v54 = vcombine.low %v657_v47, %v4443_v26  ;;  %v805_v37 = vrot.slane %v3309_v16, 1  ;;  %v4479_v40 = vld [vmem:[#allocation2 + $0x34] sm:$0x1]  ;;  %v3319_v16 = vcombine.low %v4302_v56, %v4419_v9 }
  0xd8   : > { %v3340_v59 = vcombine.low %v4397_v55, %v4397_v55  ;;  %v636_v47 = vld [vmem:[#allocation2 + $0x40] sm:$0xe]  ;;  %v3344_v56 = vcombine.low %v4345_v34, %v4433_v20  ;;  %v3343_v34 = vcombine.low %v4347_v35, %v4435_v36  ;;  %v3884_v35 = vld [vmem:[%s4956_s1 + $0x8] sm:$0xff]   ;;  %v3345_v36 = vcombine.low %v4361_v41, %v4443_v26 }
  0xd9   : > { %v1169_v2 = vrot.slane %v3353_v54, 1  ;;  %vm1374_vm1 = vcmask 293888  }
  0xda   : > { %1038 = vrot.lane.b32.xlu0 %v3338_v51, %s4065_s26  ;;  %860 = vrot.lane.b32.xlu1 %v3317_v52, %s4069_s30  ;;  %v1167_v51 = vrot.slane %v3351_v43, 1  ;;  %v3306_v52 = vcombine.low %v609_v45, %v4441_v44  ;;  %v658_v43 = vld [vmem:[#allocation2 + $0x30] sm:$0xe]  ;;  %v4481_v45 = vld [vmem:[#allocation2 + $0x44] sm:$0x1] }
  0xdc   : > { %v802_v63 = vrot.slane %v3306_v52, 1  ;;  %v4489_v52 = vld [vmem:[#allocation2 + $0x18] sm:$0xf] }
  0xdd   : > { %v3297_v28 = vcombine.low %v4489_v52, %v4411_v3  ;;  %v3342_v3 = vcombine.low %v4330_v14, %v4425_v17  ;;  %v4514_v17 = vld [vmem:[#allocation2 + $0x20] sm:$0xf] }
  0xde   : > { %1042 = vrot.lane.b32.xlu0 %v3340_v59, %s4065_s26  ;;  %1040 = vrot.lane.b32.xlu1 %v3339_v60, %s4065_s26  ;;  %v611_v59 = vld [vmem:[#allocation2 + $0x30] sm:$0xe]  ;;  %v4451_v60 = vld [vmem:[#allocation2 + $0x2c] sm:$0x1] }
  0xdf   : > { %v3308_v4 = vcombine.low %v611_v59, %v4449_v58 }
  0xe2   : > { %810 = vrot.lane.b32.xlu0 %v800_v30, %s4068_s29  ;;  %808 = vrot.lane.b32.xlu1 %v799_v5, %s4068_s29  ;;  %v3307_v30 = vcombine.low %v610_v61, %v4451_v60  ;;  %v4457_v5 = vld [vmem:[#allocation2 + $0x2c] sm:$0x1]  ;;  %v3354_v61 = vcombine.low %v658_v43, %v4479_v40 }
  0xe3   : > { %v3330_v15 = vcombine.low %v633_v31, %v4457_v5  ;;  %v3322_v26 = vcombine.low %v4363_v42, %v4457_v5  ;;  %v1078_v42 = vshrl.u32 %v3343_v34, 16 }
  0xe4   : > { %v1170_v31 = vrot.slane %v3354_v61, 1  ;;  %v4525_v61 = vld [vmem:[#allocation2 + $0x30] sm:$0xf] }
  0xe5   : > { %v986_v33 = vrot.slane %v3330_v15, 1  ;;  %v717_v15 = vshrl.u32 %v3296_v32, 16 }
  0xe6   : > { %990 = vrot.lane.b32.xlu0 %v982_v12, %s4070_s8  ;;  %812 = vrot.lane.b32.xlu1 %v801_v13, %s4068_s29  ;;  %v804_v12 = vrot.slane %v3308_v4, 1  ;;  %v803_v13 = vrot.slane %v3307_v30, 1  ;;  %v659_v4 = vld [vmem:[#allocation2 + $0x38] sm:$0xe] }
  0xea   : > { %994 = vrot.lane.b32.xlu0 %v984_v24, %s4070_s8  ;;  %992 = vrot.lane.b32.xlu1 %v983_v25, %s4070_s8  ;;  %v4469_v24 = vld [vmem:[#allocation2 + $0x34] sm:$0x1]  ;;  %v634_v25 = vld [vmem:[#allocation2 + $0x30] sm:$0xe] }
  0xee   : > { %1174 = vrot.lane.b32.xlu0 %v1166_v38, %s4071_s9  ;;  %996 = vrot.lane.b32.xlu1 %v985_v39, %s4070_s8  ;;  %v3332_v38 = vcombine.low %v635_v22, %v4467_v18  ;;  %v3331_v39 = vcombine.low %v634_v25, %v4469_v24 }
  0xf0   : > { %v988_v54 = vrot.slane %v3332_v38, 1  ;;  %v987_v59 = vrot.slane %v3331_v39, 1  ;;  %v710_v39 = vshrl.u32 %v3295_v53, 16 }
  0xf2   : > { %1178 = vrot.lane.b32.xlu0 %v1168_v48, %s4071_s9  ;;  %1176 = vrot.lane.b32.xlu1 %v1167_v51, %s4071_s9  ;;  %v3318_v48 = vcombine.low %v4304_v57, %v4409_v1  ;;  %v719_v51 = vshll.u32 %v3296_v32, 16  ;;  %v3320_v57 = vcombine.low %v4322_v10, %v4417_v7  ;;  %v3321_v32 = vcombine.low %v4339_v23, %v4427_v21  ;;  %v3883_v23 = vld [vmem:[%s4956_s1] sm:$0xff]  }
  0xf3   : > { %v3298_v21 = vcombine.low %v4514_v17, %v4441_v44  ;;  %3751 = vmatprep.subr.bf16.mxu0 %v3883_v23  ;;  %v3300_v44 = vcombine.low %v4525_v61, %v4449_v58 }
  0xf4   : > { %v721_v1 = vrot.slane %v719_v51, 1  ;;  %v889_v30 = vshll.u32 %v3318_v48, 16  ;;  %v903_v10 = vshll.u32 %v3320_v57, 16  ;;  %v887_v38 = vshrl.u32 %v3318_v48, 16  ;;  %3752 = vmatpush3.bf16.msra.mxu0 %v3883_v23 }
  0xf5   : > { %v1073_v51 = vshll.u32 %v3342_v3, 16  ;;  %v901_v48 = vshrl.u32 %v3320_v57, 16  ;;  %3753 = vmatprep.subr.bf16.mxu0 %v3884_v35  ;;  %v908_v41 = vshrl.u32 %v3321_v32, 16  ;;  %v1092_v23 = vshrl.u32 %v3345_v36, 16 }
  0xf6   : > { %814 = vrot.lane.b32.xlu0 %v802_v63, %s4068_s29  ;;  %1180 = vrot.lane.b32.xlu1 %v1169_v2, %s4071_s9  ;;  %v3333_v63 = vcombine.low %v636_v47, %v4481_v45  ;;  %v4493_v2 = vld [vmem:[#allocation2 + $0x3c] sm:$0x1]  ;;  %v891_v22 = vrot.slane %v889_v30, 1  ;;  %v722_v7 = vor.u32 %v721_v1, %v717_v15  ;;  %v905_v14 = vrot.slane %v903_v10, 1 }
  0xf7   : > { %v910_v1 = vshll.u32 %v3321_v32, 16  ;;  %v894_v30 = vshrl.u32 %v3319_v16, 16  ;;  %v1080_v10 = vshll.u32 %v3343_v34, 16  ;;  %v3324_v32 = vcombine.low %v4377_v46, %v4467_v18 }
  0xf8   : > { %v989_v8 = vrot.slane %v3333_v63, 1  ;;  %v892_v9 = vor.u32 %v891_v22, %v887_v38  ;;  %v906_v20 = vor.u32 %v905_v14, %v901_v48  ;;  %3754 = vmatpush3.bf16.msra.mxu0 %v3884_v35  ;;  %v3323_v34 = vcombine.low %v4373_v27, %v4469_v24 }
  0xf9   : > { %v912_v22 = vrot.slane %v910_v1, 1  ;;  %v1082_v38 = vrot.slane %v1080_v10, 1  ;;  %v931_v18 = vshll.u32 %v3324_v32, 16 }
  0xfa   : > { %818 = vrot.lane.b32.xlu0 %v804_v12, %s4068_s29  ;;  %816 = vrot.lane.b32.xlu1 %v803_v13, %s4068_s29  ;;  %v3355_v12 = vcombine.low %v659_v4, %v4493_v2  ;;  %v712_v13 = vshll.u32 %v3295_v53, 16  ;;  %v724_v53 = vshrl.u32 %v3297_v28, 16  ;;  %v1075_v4 = vrot.slane %v1073_v51, 1 }
  0xfc   : > { %v1171_v25 = vrot.slane %v3355_v12, 1  ;;  %v733_v12 = vshll.u32 %v3298_v21, 16 }
  0xfe   : > { %998 = vrot.lane.b32.xlu0 %v986_v33, %s4070_s8  ;;  %820 = vrot.lane.b32.xlu1 %v805_v37, %s4068_s29  ;;  %v714_v33 = vrot.slane %v712_v13, 1  ;;  %v726_v37 = vshll.u32 %v3297_v28, 16  ;;  %v1071_v28 = vshrl.u32 %v3342_v3, 16 }
 0x100   : > { %v715_v43 = vor.u32 %v714_v33, %v710_v39  ;;  %v728_v47 = vrot.slane %v726_v37, 1  ;;  %v1076_v13 = vor.u32 %v1075_v4, %v1071_v28  ;;  %v4547_v33 = vld [vmem:[#allocation2 + $0x38] sm:$0xf]  ;;  %v913_v37 = vor.u32 %v912_v22, %v908_v41  ;;  %v759_v22 = vpop.permute.xlu0 %758 }
 0x101   : > { %v1094_v39 = vshll.u32 %v3345_v36, 16  ;;  %v3301_v5 = vcombine.low %v4547_v33, %v4459_v6  ;;  %v3346_v6 = vcombine.low %v4383_v49, %v4479_v40  ;;  %v3325_v49 = vcombine.low %v4387_v50, %v4481_v45 }
 0x102   : > { %1002 = vrot.lane.b32.xlu0 %v988_v54, %s4070_s8  ;;  %1000 = vrot.lane.b32.xlu1 %v987_v59, %s4070_s8  ;;  %v896_v54 = vshll.u32 %v3319_v16, 16  ;;  %v1087_v59 = vshll.u32 %v3344_v56, 16  ;;  %v729_v63 = vor.u32 %v728_v47, %v724_v53  ;;  %v1085_v16 = vshrl.u32 %v3344_v56, 16 }
 0x103   : > { %v731_v56 = vshrl.u32 %v3298_v21, 16  ;;  %v1083_v47 = vor.u32 %v1082_v38, %v1078_v42  ;;  %v745_v53 = vshrl.u32 %v3300_v44, 16  ;;  %v4561_v21 = vld [vmem:[#allocation2 + $0x44] sm:$0x1]  ;;  %v754_v4 = vshll.u32 %v3301_v5, 16 }
 0x104   : > { %v898_v57 = vrot.slane %v896_v54, 1  ;;  %v1096_v54 = vrot.slane %v1094_v39, 1  ;;  %v3348_v27 = vcombine.low %v4397_v55, %v4561_v21  ;;  %v933_v40 = vrot.slane %v931_v18, 1  ;;  %v661_v39 = vld [vmem:[#allocation2 + $0x48] sm:$0xe] }
 0x105   : > { %v1101_v35 = vshll.u32 %v3346_v6, 16  ;;  %v924_v36 = vshll.u32 %v3323_v34, 16  ;;  %v938_v10 = vshll.u32 %v3325_v49, 16 }
 0x106   : > { %1182 = vrot.lane.b32.xlu0 %v1170_v31, %s4071_s9  ;;  %1004 = vrot.lane.b32.xlu1 %v989_v8, %s4070_s8  ;;  %v4536_v31 = vld [vmem:[#allocation2 + $0x28] sm:$0xf]  ;;  %v1089_v8 = vrot.slane %v1087_v59, 1  ;;  %v899_v15 = vor.u32 %v898_v57, %v894_v30  ;;  %v1097_v59 = vor.u32 %v1096_v54, %v1092_v23  ;;  %v915_v57 = vshrl.u32 %v3322_v26, 16 }
 0x107   : > { %v3299_v3 = vcombine.low %v4536_v31, %v4451_v60  ;;  %v747_v60 = vshll.u32 %v3300_v44, 16  ;;  %v756_v30 = vrot.slane %v754_v4, 1  ;;  %v929_v44 = vshrl.u32 %v3324_v32, 16  ;;  %v4018_v32 = vld [vmem:[#allocation2] sm:$0xf] }
 0x108   : > { %v1090_v58 = vor.u32 %v1089_v8, %v1085_v16  ;;  %v752_v8 = vshrl.u32 %v3301_v5, 16  ;;  %v1115_v55 = vshll.u32 %v3348_v27, 16  ;;  %v1103_v50 = vrot.slane %v1101_v35, 1 }
 0x109   : > { %v749_v51 = vrot.slane %v747_v60, 1  ;;  %v740_v48 = vshll.u32 %v3299_v3, 16  ;;  %v738_v1 = vshrl.u32 %v3299_v3, 16  ;;  %v926_v45 = vrot.slane %v924_v36, 1 }
 0x10a   : > { %762 = vrot.lane.b32.xlu0 %v722_v7, %s4066_s27  ;;  %1184 = vrot.lane.b32.xlu1 %v1171_v25, %s4071_s9  ;;  %v735_v7 = vrot.slane %v733_v12, 1  ;;  %v3885_v25 = vld [vmem:[%s4956_s1 + $0x10] ss:$0 sps:$4 sm:$0x33]   ;;  %v3347_v12 = vcombine.low %v4399_v29, %v4493_v2  ;;  %v1099_v16 = vshrl.u32 %v3346_v6, 16  ;;  %v922_v3 = vshrl.u32 %v3323_v34, 16 }
 0x10b   : > { %3789 = vmatprep.subr.msk.bf16.mxu0 %vm1387_vm8, %v3885_v25  ;;  %v1117_v41 = vrot.slane %v1115_v55, 1  ;;  %v660_v2 = vld [vmem:[#allocation2 + $0x40] sm:$0xe]  ;;  %v1113_v38 = vshrl.u32 %v3348_v27, 16  ;;  %v936_v60 = vshrl.u32 %v3325_v49, 16 }
 0x10c   : > { %v736_v14 = vor.u32 %v735_v7, %v731_v56  ;;  %v927_v7 = vor.u32 %v926_v45, %v922_v3  ;;  %v1108_v29 = vshll.u32 %v3347_v12, 16  ;;  %v3356_v42 = vcombine.low %v660_v2, %v4561_v21 }
 0x10d   : > { %v1118_v56 = vor.u32 %v1117_v41, %v1113_v38 }
 0x10e   : > { %942 = vrot.lane.b32.xlu0 %v892_v9, %s4072_s10  ;;  %760 = vrot.lane.b32.xlu1 %v715_v43, %s4066_s27  ;;  %v1389_v9 = vsel %vm1387_vm8, %v3885_v25, 0  ;;  %v917_v43 = vshll.u32 %v3322_v26, 16  ;;  %v4575_v26 = vpop.permute.xlu1 %1044  ;;  %v940_v25 = vrot.slane %v938_v10, 1  ;;  %v1110_v5 = vrot.slane %v1108_v29, 1 }
 0x10f   : > { %3756 = vmatpush3.bf16.msra.mxu0 %v1389_v9  ;;  %v1172_v23 = vrot.slane %v3356_v42, 1 }
 0x110   : > { %v919_v46 = vrot.slane %v917_v43, 1  ;;  %v941_v9 = vor.u32 %v940_v25, %v936_v60 }
 0x112   : > { %946 = vrot.lane.b32.xlu0 %v906_v20, %s4072_s10  ;;  %764 = vrot.lane.b32.xlu1 %v729_v63, %s4066_s27  ;;  %v750_v20 = vor.u32 %v749_v51, %v745_v53  ;;  %v742_v63 = vrot.slane %v740_v48, 1  ;;  %v920_v24 = vor.u32 %v919_v46, %v915_v57  ;;  %v4581_v43 = vpop.permute.xlu1 %1140  ;;  %v4019_v51 = vld [vmem:[#allocation2 + $0x4c] sm:$0x1] }
 0x113   : > { %v3357_v54 = vcombine.low %v661_v39, %v4019_v51 }
 0x114   : > { %v743_v28 = vor.u32 %v742_v63, %v738_v1 }
 0x115   : > { %v1173_v46 = vrot.slane %v3357_v54, 1 }
 0x116   : > { %1126 = vrot.lane.b32.xlu0 %v1076_v13, %s4067_s28  ;;  %944 = vrot.lane.b32.xlu1 %v899_v15, %s4072_s10  ;;  %v934_v13 = vor.u32 %v933_v40, %v929_v44  ;;  %v757_v15 = vor.u32 %v756_v30, %v752_v8 }
 0x11a   : > { %1130 = vrot.lane.b32.xlu0 %v1090_v58, %s4067_s28  ;;  %948 = vrot.lane.b32.xlu1 %v913_v37, %s4072_s10  ;;  %v1104_v58 = vor.u32 %v1103_v50, %v1099_v16  ;;  %v807_v37 = vpop.permute.xlu0 %806 }
 0x11e   : > { %766 = vrot.lane.b32.xlu0 %v736_v14, %s4066_s27  ;;  %1128 = vrot.lane.b32.xlu1 %v1083_v47, %s4067_s28  ;;  %v1193_v14 = vsel %vm1190_vm9, %v4018_v32, %v759_v22  ;;  %v1106_v47 = vshrl.u32 %v3347_v12, 16 }
 0x11f   : > { %v1217_v48 = vsel %vm1215_vm10, %v1193_v14, %v807_v37 }
 0x120   : > { %v1111_v34 = vor.u32 %v1110_v5, %v1106_v47 }
 0x122   : > { %770 = vrot.lane.b32.xlu0 %v750_v20, %s4066_s27  ;;  %1132 = vrot.lane.b32.xlu1 %v1097_v59, %s4067_s28 }
 0x126   : > { %950 = vrot.lane.b32.xlu0 %v920_v24, %s4072_s10  ;;  %768 = vrot.lane.b32.xlu1 %v743_v28, %s4066_s27 }
 0x12a   : > { %954 = vrot.lane.b32.xlu0 %v934_v13, %s4072_s10  ;;  %772 = vrot.lane.b32.xlu1 %v757_v15, %s4066_s27  ;;  %s3548_s27 = sshll.u32 %s4975_s25, 5 }
 0x12b   : > { %s293_s30 = scalar_lea.vmem %s4962_s7, %s3548_s27 }
 0x12e   : > { %1134 = vrot.lane.b32.xlu0 %v1104_v58, %s4067_s28  ;;  %952 = vrot.lane.b32.xlu1 %v927_v7, %s4072_s10 }
 0x132   : > { %1138 = vrot.lane.b32.xlu0 %v1118_v56, %s4067_s28  ;;  %956 = vrot.lane.b32.xlu1 %v941_v9, %s4072_s10 }
 0x134   : > { %v847_v53 = vpop.permute.xlu0 %846  ;;  %v849_v18 = vpop.permute.xlu1 %848 }
 0x135   : > { %v1234_v6 = vsel %vm1232_vm11, %v1217_v48, %v847_v53 }
 0x136   : > { %1186 = vrot.lane.b32.xlu0 %v1172_v23, %s4071_s9  ;;  %1136 = vrot.lane.b32.xlu1 %v1111_v34, %s4067_s28 }
 0x138   : > { %v851_v21 = vpop.permute.xlu0 %850 }
 0x13a   : > { %1188 = vrot.lane.b32.xlu1 %v1173_v46, %s4071_s9 }
 0x13c   : > { %v853_v20 = vpop.permute.xlu1 %852  ;;  %v1031_v59 = vpop.permute.xlu0 %1030 }
 0x140   : > { %v4590_v63 = vpop.permute.xlu1 %1032  ;;  %v4592_v4 = vpop.permute.xlu0 %1034 }
 0x144   : > { %v4594_v57 = vpop.permute.xlu1 %1036  ;;  %v4596_v1 = vpop.permute.xlu0 %854 }
 0x148   : > { %v4598_v27 = vpop.permute.xlu1 %856  ;;  %v4600_v49 = vpop.permute.xlu0 %858 }
 0x14c   : > { %v4602_v24 = vpop.permute.xlu1 %860  ;;  %v4604_v40 = vpop.permute.xlu0 %1038 }
 0x150   : > { %v4606_v28 = vpop.permute.xlu1 %1040  ;;  %v4608_v30 = vpop.permute.xlu0 %1042 }
 0x154   : > { %v809_v35 = vpop.permute.xlu1 %808  ;;  %v811_v36 = vpop.permute.xlu0 %810 }
 0x158   : > { %v813_v44 = vpop.permute.xlu1 %812  ;;  %v991_v8 = vpop.permute.xlu0 %990 }
 0x15c   : > { %v993_v12 = vpop.permute.xlu1 %992  ;;  %v995_v13 = vpop.permute.xlu0 %994 }
 0x160   : > { %v997_v55 = vpop.permute.xlu1 %996  ;;  %v1175_v15 = vpop.permute.xlu0 %1174 }
 0x164   : > { %v1177_v22 = vpop.permute.xlu1 %1176  ;;  %v1179_v50 = vpop.permute.xlu0 %1178 }
 0x168   : > { %v1181_v45 = vpop.permute.xlu1 %1180  ;;  %v4610_v10 = vpop.permute.xlu0 %814 }
 0x16c   : > { %v4612_v16 = vpop.permute.xlu1 %816  ;;  %v4614_v3 = vpop.permute.xlu0 %818 }
 0x170   : > { %v4616_v41 = vpop.permute.xlu1 %820  ;;  %v4618_v58 = vpop.permute.xlu0 %998 }
 0x174   : > { %v4620_v7 = vpop.permute.xlu1 %1000  ;;  %v4622_v25 = vpop.permute.xlu0 %1002 }
 0x178   : > { %v4624_v29 = vpop.permute.xlu1 %1004  ;;  %v4626_v2 = vpop.permute.xlu0 %1182 }
 0x17c   : > { %v4628_v37 = vpop.permute.xlu1 %1184  ;;  %v763_v38 = vpop.permute.xlu0 %762 }
 0x17d   : > { %v1199_v5 = vsel %vm1190_vm9, %v4463_v11, %v763_v38 }
 0x17e   : > { %v1221_v47 = vsel %vm1215_vm10, %v1199_v5, %v811_v36 }
 0x17f   : > { %v1238_v34 = vsel %vm1232_vm11, %v1221_v47, %v851_v21 }
 0x180   : > { %v761_v60 = vpop.permute.xlu1 %760  ;;  %v943_v39 = vpop.permute.xlu0 %942 }
 0x181   : > { %v1196_v56 = vsel %vm1190_vm9, %v4475_v19, %v761_v60  ;;  %v1251_v51 = vsel %vm1249_vm12, %v1234_v6, %v943_v39 }
 0x182   : > { %v1219_v32 = vsel %vm1215_vm10, %v1196_v56, %v809_v35  ;;  %v1268_v11 = vsel %vm1266_vm13, %v1251_v51, %v991_v8 }
 0x183   : > { %v1236_v19 = vsel %vm1232_vm11, %v1219_v32, %v849_v18  ;;  %v1285_v18 = vsel %vm1283_vm14, %v1268_v11, %v1031_v59 }
 0x184   : > { %v765_v9 = vpop.permute.xlu1 %764  ;;  %v947_v42 = vpop.permute.xlu0 %946 }
 0x185   : > { %v1202_v14 = vsel %vm1190_vm9, %v4489_v52, %v765_v9  ;;  %v1255_v52 = vsel %vm1249_vm12, %v1238_v34, %v947_v42 }
 0x186   : > { %v1223_v53 = vsel %vm1215_vm10, %v1202_v14, %v813_v44  ;;  %v1272_v38 = vsel %vm1266_vm13, %v1255_v52, %v995_v13 }
 0x187   : > { %v1240_v36 = vsel %vm1232_vm11, %v1223_v53, %v853_v20  ;;  %v1289_v20 = vsel %vm1283_vm14, %v1272_v38, %v4592_v4 }
 0x188   : > { %v945_v54 = vpop.permute.xlu1 %944  ;;  %v1127_v48 = vpop.permute.xlu0 %1126 }
 0x189   : > { %v1253_v23 = vsel %vm1249_vm12, %v1236_v19, %v945_v54  ;;  %v1302_v8 = vsel %vm1300_vm15, %v1285_v18, %v1127_v48 }
 0x18a   : > { %v1270_v6 = vsel %vm1266_vm13, %v1253_v23, %v993_v12  ;;  %v1319_v59 = vsel %vm1317_vm0, %v1302_v8, %v1175_v15 }
 0x18b   : > { %v1287_v21 = vsel %vm1283_vm14, %v1270_v6, %v4590_v63 }
 0x18c   : > { %v949_v46 = vpop.permute.xlu1 %948  ;;  %v1131_v35 = vpop.permute.xlu0 %1130 }
 0x18d   : > { %v1257_v44 = vsel %vm1249_vm12, %v1240_v36, %v949_v46  ;;  %v1306_v13 = vsel %vm1300_vm15, %v1289_v20, %v1131_v35  ;;  %v3891_v20 = vld [vmem:[#allocation4] sm:$0xff]  }
 0x18e   : > { %v1274_v56 = vsel %vm1266_vm13, %v1257_v44, %v997_v55  ;;  %v1323_v14 = vsel %vm1317_vm0, %v1306_v13, %v1179_v50  ;;  %v3895_v13 = vld [vmem:[#allocation4 + $0x8] sm:$0xff]  }
 0x18f   : > { %v1291_v63 = vsel %vm1283_vm14, %v1274_v56, %v4594_v57  ;;  %v3887_v56 = vld [vmem:[#allocation4 + $0x80] sm:$0xff]  }
 0x190   : > { %v1129_v60 = vpop.permute.xlu1 %1128  ;;  %v767_v39 = vpop.permute.xlu0 %766 }
 0x191   : > { %v1304_v12 = vsel %vm1300_vm15, %v1287_v21, %v1129_v60  ;;  %v1205_v51 = vsel %vm1190_vm9, %v4514_v17, %v767_v39 }
 0x192   : > { %v1321_v9 = vsel %vm1317_vm0, %v1304_v12, %v1177_v22  ;;  %v1225_v54 = vsel %vm1215_vm10, %v1205_v51, %v4610_v10  ;;  %v3888_v12 = vld [vmem:[#allocation4 + $0xc8] sm:$0xff]   ;;  %v3905_v51 = vld [vmem:[#allocation4 + $0x60] sm:$0xff]  }
 0x193   : > { %v3358_v42 = vcombine.low %v1319_v59, %v1321_v9  ;;  %v1242_v17 = vsel %vm1232_vm11, %v1225_v54, %v4596_v1  ;;  %v3890_v59 = vld [vmem:[#allocation4 + $0x88] sm:$0xff]   ;;  %v3892_v9 = vld [vmem:[#allocation4 + $0xd0] sm:$0xff]   ;;  %v3907_v54 = vld [vmem:[#allocation4 + $0x20] sm:$0xff]  }
 0x194   : > { %v1133_v5 = vpop.permute.xlu1 %1132  ;;  %v771_v32 = vpop.permute.xlu0 %770 }
 0x195   : > { %v1308_v55 = vsel %vm1300_vm15, %v1291_v63, %v1133_v5  ;;  %3757 = vmatprep.mubr.msk.bf16.mxu0 %vm1374_vm1, %v3358_v42  ;;  %v1211_v50 = vsel %vm1190_vm9, %v4525_v61, %v771_v32  ;;  %v3897_v42 = vld [vmem:[#allocation4 + $0x50] sm:$0xff]   ;;  %v3896_v5 = vld [vmem:[#allocation4 + $0xd8] sm:$0xff]  }
 0x196   : > { %v1325_v4 = vsel %vm1317_vm0, %v1308_v55, %v1181_v45  ;;  %v1229_v10 = vsel %vm1215_vm10, %v1211_v50, %v4614_v3  ;;  %v3894_v63 = vld [vmem:[#allocation4 + $0x90] sm:$0xff]   ;;  %v3901_v55 = vld [vmem:[#allocation4 + $0x58] sm:$0xff]  }
 0x197   : > { %v3359_v15 = vcombine.low %v1323_v14, %v1325_v4  ;;  %v1246_v1 = vsel %vm1232_vm11, %v1229_v10, %v4600_v49  ;;  %v3899_v32 = vld [vmem:[#allocation4 + $0x10] sm:$0xff]   ;;  %v3898_v14 = vld [vmem:[#allocation4 + $0x98] sm:$0xff]   ;;  %v3900_v4 = vld [vmem:[#allocation4 + $0xe0] sm:$0xff]  }
 0x198   : > { %v769_v47 = vpop.permute.xlu1 %768  ;;  %v951_v22 = vpop.permute.xlu0 %950  ;;  %v3910_v50 = vld [vmem:[#allocation4 + $0xb0] sm:$0xff]   ;;  %v3925_v10 = vld [vmem:[#allocation4 + $0x38] sm:$0xff]  }
 0x199   : > { %3758 = vmatmul.mubr.msk.bf16.vlgmr.msra.gmra.mrb[0].mxu0 %vm1374_vm1, %v3359_v15  ;;  %v1208_v57 = vsel %vm1190_vm9, %v4536_v31, %v769_v47  ;;  %v1259_v23 = vsel %vm1249_vm12, %v1242_v17, %v951_v22  ;;  %v3903_v15 = vld [vmem:[#allocation4 + $0x18] sm:$0xff]   ;;  %v3902_v47 = vld [vmem:[#allocation4 + $0xa0] sm:$0xff]   ;;  %v3904_v22 = vld [vmem:[#allocation4 + $0xe8] sm:$0xff]  }
 0x19a   : > { %v1227_v45 = vsel %vm1215_vm10, %v1208_v57, %v4612_v16  ;;  %v3906_v57 = vld [vmem:[#allocation4 + $0xa8] sm:$0xff]   ;;  %v3913_v17 = vld [vmem:[#allocation4 + $0x70] sm:$0xff]  }
 0x19b   : > { %v1244_v61 = vsel %vm1232_vm11, %v1227_v45, %v4598_v27  ;;  %v3911_v45 = vld [vmem:[#allocation4 + $0x28] sm:$0xff]  }
 0x19c   : > { %v773_v48 = vpop.permute.xlu1 %772  ;;  %v955_v19 = vpop.permute.xlu0 %954 }
 0x19d   : > { %v1214_v53 = vsel %vm1190_vm9, %v4547_v33, %v773_v48  ;;  %v1276_v33 = vsel %vm1266_vm13, %v1259_v23, %v4618_v58  ;;  %v1263_v3 = vsel %vm1249_vm12, %v1246_v1, %v955_v19  ;;  %v3908_v48 = vld [vmem:[#allocation4 + $0xf0] sm:$0xff]   ;;  %v3909_v19 = vld [vmem:[#allocation4 + $0x68] sm:$0xff]   ;;  %v3914_v23 = vld [vmem:[#allocation4 + $0xb8] sm:$0xff]  }
 0x19e   : > { %v1231_v34 = vsel %vm1215_vm10, %v1214_v53, %v4616_v41  ;;  %v1293_v6 = vsel %vm1283_vm14, %v1276_v33, %v4604_v40  ;;  %v3912_v53 = vld [vmem:[#allocation4 + $0xf8] sm:$0xff]   ;;  %v4732_v1 = vld [vmem:[%s4958_s3] ss:$0 sm:$0xff] }
 0x19f   : > { %v1248_v52 = vsel %vm1232_vm11, %v1231_v34, %v4602_v24  ;;  %v1280_v24 = vsel %vm1266_vm13, %v1263_v3, %v4622_v25  ;;  %v3931_v34 = vld [vmem:[#allocation4 + $0x1c0] sm:$0xff]  }
 0x1a0   : > { %v953_v31 = vpop.permute.xlu1 %952  ;;  %v1135_v11 = vpop.permute.xlu0 %1134  ;;  %v1297_v8 = vsel %vm1283_vm14, %v1280_v24, %v4608_v30  ;;  %v3889_v30 = vld [vmem:[#allocation4 + $0x40] sm:$0xff]  }
 0x1a1   : > { %v1261_v16 = vsel %vm1249_vm12, %v1244_v61, %v953_v31  ;;  %v1310_v49 = vsel %vm1300_vm15, %v1293_v6, %v1135_v11  ;;  %3579 = vmatprep.subr.bf16.mxu1 %v3889_v30  ;;  %v3915_v31 = vld [vmem:[#allocation4 + $0x30] sm:$0xff]   ;;  %v3921_v11 = vld [vmem:[#allocation4 + $0x78] sm:$0xff]   ;;  %v3935_v61 = vld [vmem:[#allocation4 + $0x140] sm:$0xff]  }
 0x1a2   : > { %v1278_v41 = vsel %vm1266_vm13, %v1261_v16, %v4620_v7  ;;  %v1327_v40 = vsel %vm1317_vm0, %v1310_v49, %v4626_v2  ;;  %3580 = vmatpush3.bf16.msra.mxu1 %v3891_v20  ;;  %v4727_v16 = vld [vmem:[%s4957_s2] ss:$0 sm:$0xff] }
 0x1a3   : > { %v1295_v36 = vsel %vm1283_vm14, %v1278_v41, %v4606_v28 }
 0x1a4   : > { %v957_v46 = vpop.permute.xlu1 %956  ;;  %v1139_v35 = vpop.permute.xlu0 %1138 }
 0x1a5   : > { %v1265_v27 = vsel %vm1249_vm12, %v1248_v52, %v957_v46  ;;  %v1314_v21 = vsel %vm1300_vm15, %v1297_v8, %v1139_v35 }
 0x1a6   : > { %v1282_v58 = vsel %vm1266_vm13, %v1265_v27, %v4624_v29 }
 0x1a7   : > { %v1299_v7 = vsel %vm1283_vm14, %v1282_v58, %v4575_v26 }
 0x1a8   : > { %v1137_v18 = vpop.permute.xlu1 %1136  ;;  %v1187_v38 = vpop.permute.xlu0 %1186  ;;  %v1316_v28 = vsel %vm1300_vm15, %v1299_v7, %v4581_v43  ;;  %v3893_v43 = vld [vmem:[#allocation4 + $0x48] sm:$0xff]  }
 0x1a9   : > { %v1312_v44 = vsel %vm1300_vm15, %v1295_v36, %v1137_v18  ;;  %v1331_v39 = vsel %vm1317_vm0, %v1314_v21, %v1187_v38  ;;  %3581 = vmatprep.subr.bf16.mxu1 %v3893_v43 }
 0x1aa   : > { %v1329_v29 = vsel %vm1317_vm0, %v1312_v44, %v4628_v37  ;;  %v3886_v37 = vld [vmem:[#allocation4 + $0xc0] sm:$0xff]   ;;  %3582 = vmatpush3.bf16.msra.mxu1 %v3895_v13 }
 0x1ab   : > { %v3360_v25 = vcombine.low %v1327_v40, %v1329_v29  ;;  %3619 = vmatprep.subr.bf16.mxu0 %v3886_v37  ;;  %3583 = vmatprep.subr.bf16.mxu1 %v3897_v42 }
 0x1ac   : > { %v1189_v60 = vpop.permute.xlu1 %1188  ;;  %3620 = vmatpush3.bf16.msra.mxu0 %v3887_v56 }
 0x1ad   : > { %v1333_v26 = vsel %vm1317_vm0, %v1316_v28, %v1189_v60  ;;  %3761 = vmatprep.mubr.msk.bf16.mxu0 %vm1374_vm1, %v3360_v25  ;;  %3621 = vmatprep.subr.bf16.mxu0 %v3888_v12 }
 0x1ae   : > { %v3361_v2 = vcombine.low %v1331_v39, %v1333_v26  ;;  %3584 = vmatpush3.bf16.msra.mxu1 %v3899_v32 }
 0x1af   : > { %3585 = vmatprep.subr.bf16.mxu1 %v3901_v55 }
 0x1b0   : > { %3762 = vmatmul.mubr.msk.bf16.gmra.mrb[4].mxu0 %vm1374_vm1, %v3361_v2 }
 0x1b1   : > { %3622 = vmatpush3.bf16.msra.mxu0 %v3890_v59 }
 0x1b2   : > { %3623 = vmatprep.subr.bf16.mxu0 %v3892_v9  ;;  %3586 = vmatpush3.bf16.msra.mxu1 %v3903_v15 }
 0x1b3   : > { %3587 = vmatprep.subr.bf16.mxu1 %v3905_v51 }
 0x1b5   : > { %3624 = vmatpush3.bf16.msra.mxu0 %v3894_v63 }
 0x1b6   : > { %3625 = vmatprep.subr.bf16.mxu0 %v3896_v5  ;;  %3588 = vmatpush3.bf16.msra.mxu1 %v3907_v54 }
 0x1b7   : > { %3589 = vmatprep.subr.bf16.mxu1 %v3909_v19 }
 0x1b9   : > { %3626 = vmatpush3.bf16.msra.mxu0 %v3898_v14 }
 0x1ba   : > { %3627 = vmatprep.subr.bf16.mxu0 %v3900_v4  ;;  %3590 = vmatpush3.bf16.msra.mxu1 %v3911_v45 }
 0x1bb   : > { %3591 = vmatprep.subr.bf16.mxu1 %v3913_v17 }
 0x1bd   : > { %3628 = vmatpush3.bf16.msra.mxu0 %v3902_v47 }
 0x1be   : > { %3629 = vmatprep.subr.bf16.mxu0 %v3904_v22  ;;  %3592 = vmatpush3.bf16.msra.mxu1 %v3915_v31 }
 0x1bf   : > { %3593 = vmatprep.subr.bf16.mxu1 %v3921_v11 }
 0x1c1   : > { %3630 = vmatpush3.bf16.msra.mxu0 %v3906_v57 }
 0x1c2   : > { %3631 = vmatprep.subr.bf16.mxu0 %v3908_v48  ;;  %3594 = vmatpush3.bf16.msra.mxu1 %v3925_v10 }
 0x1c3   : > { %3659 = vmatprep.subr.bf16.mxu1 %v3935_v61 }
 0x1c5   : > { %3632 = vmatpush3.bf16.msra.mxu0 %v3910_v50 }
 0x1c6   : > { %3633 = vmatprep.subr.bf16.mxu0 %v3912_v53 }
 0x1c9   : > { %3634 = vmatpush3.bf16.msra.mxu0 %v3914_v23 }
 0x1ca   : > { %3699 = vmatprep.subr.bf16.mxu0 %v3931_v34 }
 0x26c   : > { %v3759_v33 = vpop.f32.mrb[0].mxu0 }
 0x26d   : > { %v1465_v52 = vmul.f32 %v3759_v33, %v4727_v16  ;;  %v1425_v46 = vpop.f32.mrb[1].mxu0  ;;  %v1668_v33 = vld [vmem:[#allocation3 + $0x4] sm:$0x1] }
 0x26e   : > { %v1463_v35 = vmul.f32 %v4727_v16, %v1425_v46  ;;  %v3760_v3 = vpop.f32.mrb[2].mxu0 }
 0x26f   : > { %v1480_v41 = vadd.f32 %v4732_v1, %v1465_v52  ;;  %v1466_v27 = vmul.f32 %v3760_v3, %v4727_v16  ;;  %v1428_v6 = vpop.f32.mrb[3].mxu0  ;;  %v1676_v52 = vld [vmem:[#allocation3] sm:$0xe] }
 0x270   : > { %v1478_v58 = vadd.f32 %v4732_v1, %v1463_v35  ;;  %v1464_v49 = vmul.f32 %v4727_v16, %v1428_v6  ;;  %v4764_v3 = vld [vmem:[#allocation3] sm:$0xf] }
 0x271   : > { %v1488_v24 = vmax.f32 %v1480_v41, 0.0  ;;  %v1481_v36 = vadd.f32 %v4732_v1, %v1466_v27 }
 0x272   : > { %v1486_v18 = vmax.f32 %v1478_v58, 0.0  ;;  %v1479_v44 = vadd.f32 %v4732_v1, %v1464_v49 }
 0x273   : > { %v1501_v7 = vpack.c.bf16 %v1488_v24, %v1488_v24  ;;  %v1489_v40 = vmax.f32 %v1481_v36, 0.0 }
 0x274   : > { %v1499_v29 = vpack.c.bf16 %v1486_v18, %v1486_v18  ;;  %v1487_v38 = vmax.f32 %v1479_v44, 0.0  ;;  %v3395_v18 = vcombine.low %v1676_v52, %v1668_v33 }
 0x275   : > { %v1522_v8 = vshrl.u32 %v1501_v7, 16  ;;  %v1502_v25 = vpack.c.bf16 %v1489_v40, %v1489_v40  ;;  %v1525_v39 = vshll.u32 %v1501_v7, 16 }
 0x276   : > { %v1508_v21 = vshrl.u32 %v1499_v29, 16  ;;  %v1500_v28 = vpack.c.bf16 %v1487_v38, %v1487_v38  ;;  %v1511_v37 = vshll.u32 %v1499_v29, 16 }
 0x277   : > { %v1524_v60 = vrot.slane %v1522_v8, 7  ;;  %v1529_v26 = vshrl.u32 %v1502_v25, 16  ;;  %v1532_v20 = vshll.u32 %v1502_v25, 16 }
 0x278   : > { %v1510_v2 = vrot.slane %v1508_v21, 7  ;;  %v1515_v56 = vshrl.u32 %v1500_v28, 16  ;;  %v1518_v9 = vshll.u32 %v1500_v28, 16 }
 0x279   : > { %v1527_v12 = vor.u32 %v1525_v39, %v1524_v60  ;;  %v1531_v30 = vrot.slane %v1529_v26, 7  ;;  %v1853_v39 = vrot.slane %v3395_v18, 1 }
 0x27a   : > { %v1513_v59 = vor.u32 %v1511_v37, %v1510_v2  ;;  %v1517_v43 = vrot.slane %v1515_v56, 7 }
 0x27b   : > { %v1573_v13 = vsel %vm4265_vm6, 0, %v1527_v12  ;;  %v1534_v42 = vor.u32 %v1532_v20, %v1531_v30 }
 0x27c   : > { %v1581_v63 = vsel %vm4270_vm7, %v1573_v13, 0  ;;  %v1571_v5 = vsel %vm4265_vm6, 0, %v1513_v59  ;;  %v1520_v32 = vor.u32 %v1518_v9, %v1517_v43 }
 0x27d   : > { %v3375_v55 = vcombine.low %v1581_v63, %v1581_v63  ;;  %v3376_v14 = vcombine.high %v1581_v63, %v1581_v63  ;;  %v1579_v4 = vsel %vm4270_vm7, %v1571_v5, 0  ;;  %v1574_v15 = vsel %vm4265_vm6, 0, %v1534_v42 }
 0x27e   : > { %v3371_v47 = vcombine.low %v1579_v4, %v1579_v4  ;;  %v3372_v22 = vcombine.high %v1579_v4, %v1579_v4  ;;  %v1582_v51 = vsel %vm4270_vm7, %v1574_v15, 0  ;;  %v1572_v57 = vsel %vm4265_vm6, 0, %v1520_v32 }
 0x27f   : > { %1648 = vst [vmem:[#allocation3 + $0x18] sm:$0xf] %v3375_v55  ;;  %1649 = vst [vmem:[#allocation3 + $0x1c] sm:$0x1] %v3376_v14  ;;  %v3377_v54 = vcombine.low %v1582_v51, %v1582_v51  ;;  %v3378_v48 = vcombine.high %v1582_v51, %v1582_v51  ;;  %v1580_v19 = vsel %vm4270_vm7, %v1572_v57, 0  ;;  %v3934_v14 = vld [vmem:[#allocation4 + $0x180] sm:$0xff]  }
 0x280   : > { %1644 = vst [vmem:[#allocation3 + $0x8] sm:$0xf] %v3371_v47  ;;  %1645 = vst [vmem:[#allocation3 + $0xc] sm:$0x1] %v3372_v22  ;;  %v3373_v50 = vcombine.low %v1580_v19, %v1580_v19  ;;  %v3374_v45 = vcombine.high %v1580_v19, %v1580_v19  ;;  %v3936_v57 = vld [vmem:[#allocation4 + $0x1c8] sm:$0xff]  }
 0x281   : > { %1650 = vst [vmem:[#allocation3 + $0x20] sm:$0xf] %v3377_v54  ;;  %1651 = vst [vmem:[#allocation3 + $0x24] sm:$0x1] %v3378_v48 }
 0x282   : > { %1646 = vst [vmem:[#allocation3 + $0x10] sm:$0xf] %v3373_v50  ;;  %1647 = vst [vmem:[#allocation3 + $0x14] sm:$0x1] %v3374_v45 }
 0x283   : > { %v3763_v53 = vpop.f32.mrb[4].mxu0 }
 0x284   : > { %v1469_v17 = vmul.f32 %v3763_v53, %v4727_v16  ;;  %v1441_v23 = vpop.f32.mrb[5].mxu0 }
 0x285   : > { %v1467_v31 = vmul.f32 %v4727_v16, %v1441_v23  ;;  %v3764_v11 = vpop.f32.mrb[6].mxu0 }
 0x286   : > { %v1484_v10 = vadd.f32 %v4732_v1, %v1469_v17  ;;  %v1470_v34 = vmul.f32 %v3764_v11, %v4727_v16  ;;  %v1444_v61 = vpop.f32.mrb[7].mxu0  ;;  %v4786_v22 = vld [vmem:[#allocation3 + $0x18] sm:$0xf] }
 0x287   : > { %v1482_v46 = vadd.f32 %v4732_v1, %v1467_v31  ;;  %v1468_v35 = vmul.f32 %v4727_v16, %v1444_v61  ;;  %v4767_v6 = vld [vmem:[#allocation3 + $0xc] sm:$0x1]  ;;  %v1677_v36 = vld [vmem:[#allocation3 + $0x8] sm:$0xe]  ;;  %v4775_v16 = vcombine.low %v4764_v3, %v1668_v33  ;;  %v3938_v17 = vld [vmem:[#allocation4 + $0x188] sm:$0xff]  }
 0x288   : > { %v1492_v41 = vmax.f32 %v1484_v10, 0.0  ;;  %v1485_v27 = vadd.f32 %v4732_v1, %v1470_v34  ;;  %v4772_v40 = vld [vmem:[#allocation3 + $0x8] sm:$0xf]  ;;  %v4781_v42 = vld [vmem:[#allocation3 + $0x20] sm:$0xf] }
 0x289   : > { %v1490_v58 = vmax.f32 %v1482_v46, 0.0  ;;  %v1483_v49 = vadd.f32 %v4732_v1, %v1468_v35  ;;  %v4770_v24 = vld [vmem:[#allocation3 + $0x10] sm:$0xf]  ;;  %v3396_v1 = vcombine.low %v1677_v36, %v4767_v6  ;;  %v1776_v56 = vshll.u32 %v4775_v16, 16  ;;  %v4794_v45 = vld [vmem:[#allocation3 + $0x8] sm:$0xf] }
 0x28a   : > { %v1505_v44 = vpack.c.bf16 %v1492_v41, %v1492_v41  ;;  %v1493_v7 = vmax.f32 %v1485_v27, 0.0  ;;  %v3438_v8 = vcombine.low %v4772_v40, %v4770_v24  ;;  %v1774_v55 = vshrl.u32 %v4775_v16, 16  ;;  %v4796_v53 = vld [vmem:[#allocation3 + $0x10] sm:$0xf]  ;;  %v4802_v34 = vld [vmem:[#allocation3 + $0x18] sm:$0xf] }
 0x28b   : > { %v1503_v29 = vpack.c.bf16 %v1490_v58, %v1490_v58  ;;  %v1491_v38 = vmax.f32 %v1483_v49, 0.0  ;;  %v1854_v13 = vrot.slane %v3396_v1, 1  ;;  %v1778_v51 = vrot.slane %v1776_v56, 1  ;;  %v1670_v61 = vld [vmem:[#allocation3 + $0x14] sm:$0x1]  ;;  %v3943_v1 = vld [vmem:[#allocation4 + $0x190] sm:$0xff]  }
 0x28c   : > { %v1550_v25 = vshrl.u32 %v1505_v44, 16  ;;  %v1506_v21 = vpack.c.bf16 %v1493_v7, %v1493_v7  ;;  %2910 = vmatprep.mubr.bf16.mxu0 %v3438_v8  ;;  %v1553_v2 = vshll.u32 %v1505_v44, 16  ;;  %v3447_v50 = vcombine.low %v4786_v22, %v4781_v42  ;;  %v1671_v41 = vld [vmem:[#allocation3 + $0x1c] sm:$0x1]  ;;  %v1678_v27 = vld [vmem:[#allocation3 + $0x10] sm:$0xe] }
 0x28d   : > { %v1536_v28 = vshrl.u32 %v1503_v29, 16  ;;  %v1504_v60 = vpack.c.bf16 %v1491_v38, %v1491_v38  ;;  %v1539_v30 = vshll.u32 %v1503_v29, 16  ;;  %v3437_v47 = vcombine.low %v1853_v39, %v1854_v13  ;;  %v1679_v44 = vld [vmem:[#allocation3 + $0x18] sm:$0xe]  ;;  %v3941_v7 = vld [vmem:[#allocation4 + $0x1d0] sm:$0xff]  }
 0x28e   : > { %v1552_v26 = vrot.slane %v1550_v25, 7  ;;  %v1557_v37 = vshrl.u32 %v1506_v21, 16  ;;  %v1560_v9 = vshll.u32 %v1506_v21, 16  ;;  %v3388_v18 = vcombine.low %v4794_v45, %v4767_v6  ;;  %v1672_v56 = vld [vmem:[#allocation3 + $0x24] sm:$0x1] }
 0x28f   : > { %v1538_v12 = vrot.slane %v1536_v28, 7  ;;  %v1543_v20 = vshrl.u32 %v1504_v60, 16  ;;  %v1546_v32 = vshll.u32 %v1504_v60, 16  ;;  %2911 = vmatmul.mubr.bf16.vlgmr.msra.gmra.mrb[8].mxu0 %v3437_v47  ;;  %v3389_v29 = vcombine.low %v4796_v53, %v1670_v61  ;;  %v3945_v28 = vld [vmem:[#allocation4 + $0x1d8] sm:$0xff]   ;;  %v4814_v60 = vld [vmem:[#allocation3 + $0x20] sm:$0xf] }
 0x290   : > { %v1555_v59 = vor.u32 %v1553_v2, %v1552_v26  ;;  %v1559_v43 = vrot.slane %v1557_v37, 7  ;;  %2918 = vmatprep.mubr.bf16.mxu0 %v3447_v50  ;;  %3700 = vmatpush3.bf16.msra.mxu0 %v3934_v14  ;;  %v1783_v38 = vshll.u32 %v3388_v18, 16  ;;  %v3390_v8 = vcombine.low %v4802_v34, %v1671_v41  ;;  %v3947_v14 = vld [vmem:[#allocation4 + $0x198] sm:$0xff]  }
 0x291   : > { %v1541_v63 = vor.u32 %v1539_v30, %v1538_v12  ;;  %v1545_v5 = vrot.slane %v1543_v20, 7  ;;  %3701 = vmatprep.subr.bf16.mxu0 %v3936_v57  ;;  %v3397_v25 = vcombine.low %v1678_v27, %v1670_v61  ;;  %v1779_v0 = vor.u32 %v1778_v51, %v1774_v55  ;;  %v3940_v55 = vld [vmem:[#allocation4 + $0x148] sm:$0xff]  }
 0x292   : > { %v1577_v4 = vsel %vm4265_vm6, 0, %v1555_v59  ;;  %v1562_v15 = vor.u32 %v1560_v9, %v1559_v43  ;;  %v1790_v21 = vshll.u32 %v3389_v29, 16  ;;  %v3398_v6 = vcombine.low %v1679_v44, %v1671_v41  ;;  %v1680_v59 = vld [vmem:[#allocation3 + $0x20] sm:$0xe]  ;;  %v3963_v44 = vld [vmem:[#allocation4 + $0x1e8] sm:$0xff]  }
 0x293   : > { %v1585_v54 = vsel %vm4270_vm7, %v1577_v4, 0  ;;  %v1575_v48 = vsel %vm4265_vm6, 0, %v1541_v63  ;;  %v1548_v19 = vor.u32 %v1546_v32, %v1545_v5  ;;  %v1781_v39 = vshrl.u32 %v3388_v18, 16  ;;  %v3937_v32 = vld [vmem:[#allocation4 + $0x100] sm:$0xff]  }
 0x294   : > { %v3383_v23 = vcombine.low %v1585_v54, %v1585_v54  ;;  %v3384_v31 = vcombine.high %v1585_v54, %v1585_v54  ;;  %v1583_v11 = vsel %vm4270_vm7, %v1575_v48, 0  ;;  %v1578_v10 = vsel %vm4265_vm6, 0, %v1562_v15  ;;  %3702 = vmatpush3.bf16.msra.mxu0 %v3938_v17  ;;  %v3956_v54 = vld [vmem:[#allocation4 + $0x1e0] sm:$0xff]  }
 0x295   : > { %v3379_v33 = vcombine.low %v1583_v11, %v1583_v11  ;;  %v3380_v52 = vcombine.high %v1583_v11, %v1583_v11  ;;  %v1586_v46 = vsel %vm4270_vm7, %v1578_v10, 0  ;;  %v1576_v35 = vsel %vm4265_vm6, 0, %v1548_v19  ;;  %3703 = vmatprep.subr.bf16.mxu0 %v3941_v7  ;;  %v4819_v48 = vld [vmem:[#allocation3 + $0x10] sm:$0xf]  ;;  %v4821_v19 = vld [vmem:[#allocation3 + $0x18] sm:$0xf] }
 0x296   : > { %1656 = vst [vmem:[#allocation3 + $0x38] sm:$0xf] %v3383_v23  ;;  %1657 = vst [vmem:[#allocation3 + $0x3c] sm:$0x1] %v3384_v31  ;;  %v3385_v58 = vcombine.low %v1586_v46, %v1586_v46  ;;  %v3386_v49 = vcombine.high %v1586_v46, %v1586_v46  ;;  %v1584_v36 = vsel %vm4270_vm7, %v1576_v35, 0  ;;  %v1785_v26 = vrot.slane %v1783_v38, 1 }
 0x297   : > { %1652 = vst [vmem:[#allocation3 + $0x28] sm:$0xf] %v3379_v33  ;;  %1653 = vst [vmem:[#allocation3 + $0x2c] sm:$0x1] %v3380_v52  ;;  %v3381_v62 = vcombine.low %v1584_v36, %v1584_v36  ;;  %v3382_v16 = vcombine.high %v1584_v36, %v1584_v36  ;;  %v1797_v2 = vshll.u32 %v3390_v8, 16  ;;  %v1855_v37 = vrot.slane %v3397_v25, 1 }
 0x298   : > { %1658 = vst [vmem:[#allocation3 + $0x40] sm:$0xf] %v3385_v58  ;;  %1659 = vst [vmem:[#allocation3 + $0x44] sm:$0x1] %v3386_v49  ;;  %v1788_v12 = vshrl.u32 %v3389_v29, 16  ;;  %v1792_v30 = vrot.slane %v1790_v21, 1  ;;  %v1786_v43 = vor.u32 %v1785_v26, %v1781_v39  ;;  %3704 = vmatpush3.bf16.msra.mxu0 %v3943_v1  ;;  %v3391_v51 = vcombine.low %v4814_v60, %v1672_v56 }
 0x299   : > { %1654 = vst [vmem:[#allocation3 + $0x30] sm:$0xf] %v3381_v62  ;;  %1655 = vst [vmem:[#allocation3 + $0x34] sm:$0x1] %v3382_v16  ;;  %v1856_v20 = vrot.slane %v3398_v6, 1  ;;  %v1795_v9 = vshrl.u32 %v3390_v8, 16  ;;  %3705 = vmatprep.subr.bf16.mxu0 %v3945_v28  ;;  %v3399_v57 = vcombine.low %v1680_v59, %v1672_v56  ;;  %v3435_v50 = vcombine.low %v4764_v3, %v4794_v45 }
 0x29a   : > { %v1799_v13 = vrot.slane %v1797_v2, 1  ;;  %v1793_v63 = vor.u32 %v1792_v30, %v1788_v12  ;;  %v3436_v4 = vcombine.low %v1779_v0, %v1786_v43  ;;  %v4825_v31 = vld [vmem:[#allocation3 + $0x14] sm:$0x1]  ;;  %v3942_v10 = vld [vmem:[#allocation4 + $0x108] sm:$0xff]   ;;  %v3444_v58 = vcombine.low %v4796_v53, %v4802_v34  ;;  %v3944_v62 = vld [vmem:[#allocation4 + $0x150] sm:$0xff]  }
 0x29b   : > { %v3446_v5 = vcombine.low %v1855_v37, %v1856_v20  ;;  %v4832_v35 = vld [vmem:[#allocation3 + $0x1c] sm:$0x1]  ;;  %v3961_v45 = vld [vmem:[#allocation4 + $0x1a0] sm:$0xff]   ;;  %v1857_v49 = vrot.slane %v3399_v57, 1  ;;  %v1804_v18 = vshll.u32 %v3391_v51, 16  ;;  %v3419_v25 = vcombine.low %v4819_v48, %v4825_v31  ;;  %v3946_v30 = vld [vmem:[#allocation4 + $0x110] sm:$0xff]  }
 0x29c   : > { %v1800_v15 = vor.u32 %v1799_v13, %v1795_v9  ;;  %2845 = vmatprep.mubr.bf16.mxu1 %v3436_v4  ;;  %3706 = vmatpush3.bf16.msra.mxu0 %v3947_v14  ;;  %v3420_v53 = vcombine.low %v4821_v19, %v4832_v35  ;;  %v1802_v0 = vshrl.u32 %v3391_v51, 16  ;;  %v3966_v37 = vld [vmem:[#allocation4 + $0x1a8] sm:$0xff]   ;;  %v3955_v20 = vld [vmem:[#allocation4 + $0x158] sm:$0xff]   ;;  %v4854_v4 = vld [vmem:[#allocation3 + $0x20] sm:$0xf] }
 0x29d   : > { %2919 = vmatmul.mubr.bf16.gmra.mrb[12].mxu0 %v3446_v5  ;;  %2846 = vmatmul.mubr.bf16.vlgmr.msra.gmra.mrb[0].mxu1 %v3435_v50  ;;  %v4838_v27 = vld [vmem:[#allocation3 + $0x38] sm:$0xf]  ;;  %v1675_v38 = vld [vmem:[#allocation3 + $0x3c] sm:$0x1]  ;;  %v1806_v21 = vrot.slane %v1804_v18, 1  ;;  %v2032_v14 = vshll.u32 %v3419_v25, 16 }
 0x29e   : > { %v4816_v47 = vld [vmem:[#allocation3 + $0x28] sm:$0xf]  ;;  %v1673_v17 = vld [vmem:[#allocation3 + $0x2c] sm:$0x1]  ;;  %v3445_v11 = vcombine.low %v1793_v63, %v1800_v15  ;;  %3660 = vmatpush3.bf16.msra.mxu1 %v3937_v32  ;;  %3707 = vmatprep.subr.bf16.mxu0 %v3956_v54  ;;  %v3394_v6 = vcombine.low %v4838_v27, %v1675_v38  ;;  %v1683_v28 = vld [vmem:[#allocation3 + $0x38] sm:$0xe] }
 0x29f   : > { %v1681_v23 = vld [vmem:[#allocation3 + $0x28] sm:$0xe]  ;;  %v3392_v52 = vcombine.low %v4816_v47, %v1673_v17  ;;  %3661 = vmatprep.subr.bf16.mxu1 %v3940_v55  ;;  %v4842_v16 = vld [vmem:[#allocation3 + $0x40] sm:$0xf]  ;;  %v4850_v39 = vld [vmem:[#allocation3 + $0x38] sm:$0xf]  ;;  %v1807_v43 = vor.u32 %v1806_v21, %v1802_v0  ;;  %v3402_v55 = vcombine.low %v1683_v28, %v1675_v38 }
 0x2a0   : > { %v4827_v61 = vld [vmem:[#allocation3 + $0x28] sm:$0xf]  ;;  %v4829_v33 = vld [vmem:[#allocation3 + $0x30] sm:$0xf]  ;;  %v3400_v46 = vcombine.low %v1681_v23, %v1673_v17  ;;  %2853 = vmatprep.mubr.bf16.mxu1 %v3445_v11  ;;  %v1674_v7 = vld [vmem:[#allocation3 + $0x34] sm:$0x1]  ;;  %3708 = vmatpush3.bf16.msra.mxu0 %v3961_v45  ;;  %v3465_v59 = vcombine.low %v4850_v39, %v4842_v16 }
 0x2a1   : > { %v3456_v3 = vcombine.low %v4827_v61, %v4829_v33  ;;  %v4836_v41 = vld [vmem:[#allocation3 + $0x30] sm:$0xf]  ;;  %v1811_v29 = vshll.u32 %v3392_v52, 16  ;;  %v1809_v26 = vshrl.u32 %v3392_v52, 16  ;;  %3709 = vmatprep.subr.bf16.mxu0 %v3963_v44  ;;  %v1825_v13 = vshll.u32 %v3394_v6, 16  ;;  %v3972_v63 = vld [vmem:[#allocation4 + $0x1f0] sm:$0xff]  }
 0x2a2   : > { %v1858_v36 = vrot.slane %v3400_v46, 1  ;;  %v3393_v8 = vcombine.low %v4836_v41, %v1674_v7  ;;  %v1682_v1 = vld [vmem:[#allocation3 + $0x30] sm:$0xe]  ;;  %3662 = vmatpush3.bf16.msra.mxu1 %v3942_v10  ;;  %v4856_v15 = vld [vmem:[#allocation3 + $0x24] sm:$0x1]  ;;  %v2039_v57 = vshll.u32 %v3420_v53, 16 }
 0x2a3   : > { %2926 = vmatprep.mubr.bf16.mxu0 %v3456_v3  ;;  %v1813_v2 = vrot.slane %v1811_v29, 1  ;;  %v3401_v12 = vcombine.low %v1682_v1, %v1674_v7  ;;  %3663 = vmatprep.subr.bf16.mxu1 %v3944_v62  ;;  %v1827_v51 = vrot.slane %v1825_v13, 1  ;;  %v4858_v54 = vld [vmem:[#allocation3 + $0x28] sm:$0xf]  ;;  %v4860_v50 = vld [vmem:[#allocation3 + $0x2c] sm:$0x1]  ;;  %v3421_v29 = vcombine.low %v4854_v4, %v4856_v15 }
 0x2a4   : > { %v3455_v34 = vcombine.low %v1857_v49, %v1858_v36  ;;  %v1818_v56 = vshll.u32 %v3393_v8, 16  ;;  %v1816_v9 = vshrl.u32 %v3393_v8, 16  ;;  %3710 = vmatpush3.bf16.msra.mxu0 %v3966_v37  ;;  %v3974_v11 = vld [vmem:[#allocation4 + $0x1b0] sm:$0xff]   ;;  %v2030_v10 = vshrl.u32 %v3419_v25, 16  ;;  %v3960_v46 = vld [vmem:[#allocation4 + $0x118] sm:$0xff]   ;;  %v3962_v7 = vld [vmem:[#allocation4 + $0x160] sm:$0xff]  }
 0x2a5   : > { %v1814_v5 = vor.u32 %v1813_v2, %v1809_v26  ;;  %2854 = vmatmul.mubr.bf16.gmra.mrb[4].mxu1 %v3444_v58  ;;  %v1859_v23 = vrot.slane %v3401_v12, 1  ;;  %v2034_v52 = vrot.slane %v2032_v14, 1  ;;  %v1823_v45 = vshrl.u32 %v3394_v6, 16  ;;  %3711 = vmatprep.subr.bf16.mxu0 %v3972_v63  ;;  %v3978_v18 = vld [vmem:[#allocation4 + $0x1f8] sm:$0xff]   ;;  %v1693_v44 = vld [vmem:[#allocation3 + $0x14] sm:$0x1] }
 0x2a6   : > { %2927 = vmatmul.mubr.bf16.gmra.mrb[16].mxu0 %v3455_v34  ;;  %v1820_v32 = vrot.slane %v1818_v56, 1  ;;  %3664 = vmatpush3.bf16.msra.mxu1 %v3946_v30  ;;  %v2037_v49 = vshrl.u32 %v3420_v53, 16  ;;  %v2041_v36 = vrot.slane %v2039_v57, 1  ;;  %v1860_v62 = vrot.slane %v3402_v55, 1  ;;  %v1701_v34 = vld [vmem:[#allocation3 + $0x10] sm:$0xe] }
 0x2a7   : > { %2934 = vmatprep.mubr.bf16.mxu0 %v3465_v59  ;;  %v3454_v17 = vcombine.low %v1807_v43, %v1814_v5  ;;  %3665 = vmatprep.subr.bf16.mxu1 %v3955_v20  ;;  %v2035_v58 = vor.u32 %v2034_v52, %v2030_v10  ;;  %v3422_v38 = vcombine.low %v4858_v54, %v4860_v50  ;;  %v4866_v0 = vld [vmem:[#allocation3 + $0x30] sm:$0xf]  ;;  %v4868_v53 = vld [vmem:[#allocation3 + $0x38] sm:$0xf]  ;;  %v3981_v6 = vld [vmem:[#allocation4 + $0x1b8] sm:$0xff]   ;;  %v2046_v1 = vshll.u32 %v3421_v29, 16 }
 0x2a8   : > { %v1821_v3 = vor.u32 %v1820_v32, %v1816_v9  ;;  %v1828_v8 = vor.u32 %v1827_v51, %v1823_v45  ;;  %v2042_v25 = vor.u32 %v2041_v36, %v2037_v49  ;;  %v3464_v21 = vcombine.low %v1859_v23, %v1860_v62  ;;  %3712 = vmatpush3.bf16.msra.mxu0 %v3974_v11  ;;  %v4870_v28 = vld [vmem:[#allocation3 + $0x34] sm:$0x1]  ;;  %v4872_v26 = vld [vmem:[#allocation3 + $0x3c] sm:$0x1]  ;;  %v1692_v2 = vld [vmem:[#allocation3 + $0xc] sm:$0x1] }
 0x2a9   : > { %2861 = vmatprep.mubr.bf16.mxu1 %v3454_v17  ;;  %v3965_v37 = vld [vmem:[#allocation4 + $0x120] sm:$0xff]   ;;  %3713 = vmatprep.subr.bf16.mxu0 %v3978_v18  ;;  %v2053_v30 = vshll.u32 %v3422_v38, 16  ;;  %v4875_v20 = vcombine.low %v4770_v24, %v1693_v44  ;;  %v3453_v59 = vcombine.low %v4814_v60, %v4816_v47  ;;  %v3971_v43 = vld [vmem:[#allocation4 + $0x168] sm:$0xff]   ;;  %v1700_v9 = vld [vmem:[#allocation3 + $0x8] sm:$0xe]  ;;  %v3412_v13 = vcombine.low %v1701_v34, %v1693_v44 }
 0x2aa   : > { %3666 = vmatpush3.bf16.msra.mxu1 %v3960_v46  ;;  %v3463_v56 = vcombine.low %v1821_v3, %v1828_v8  ;;  %v3442_v12 = vcombine.low %v2035_v58, %v2042_v25  ;;  %v2051_v63 = vshrl.u32 %v3422_v38, 16  ;;  %v2048_v5 = vrot.slane %v2046_v1, 1  ;;  %v3973_v60 = vld [vmem:[#allocation4 + $0x128] sm:$0xff]   ;;  %v4888_v23 = vld [vmem:[#allocation3 + $0x48] sm:$0xf]  ;;  %v3977_v52 = vld [vmem:[#allocation4 + $0x170] sm:$0xff]  }
 0x2ab   : > { %3667 = vmatprep.subr.bf16.mxu1 %v3962_v7  ;;  %v2055_v32 = vrot.slane %v2053_v30, 1  ;;  %v3423_v55 = vcombine.low %v4866_v0, %v4870_v28  ;;  %v4883_v14 = vcombine.low %v4868_v53, %v4872_v26  ;;  %v4886_v24 = vcombine.low %v4772_v40, %v1692_v2  ;;  %v4890_v11 = vld [vmem:[#allocation3 + $0x4c] sm:$0x1]  ;;  %v4893_v46 = vld [vmem:[#allocation3 + $0x40] sm:$0xf] }
 0x2ac   : > { %3714 = vmatpush3.bf16.msra.mxu0 %v3981_v6  ;;  %v3411_v47 = vcombine.low %v1700_v9, %v1692_v2  ;;  %v2044_v51 = vshrl.u32 %v3421_v29, 16  ;;  %v1911_v10 = vshll.u32 %v4875_v20, 16  ;;  %v4895_v40 = vld [vmem:[#allocation3 + $0x44] sm:$0x1]  ;;  %v1982_v45 = vrot.slane %v3412_v13, 1  ;;  %v3986_v9 = vld [vmem:[#allocation4 + $0x138] sm:$0xff]  }
 0x2ad   : > { %2862 = vmatmul.mubr.bf16.gmra.mrb[8].mxu1 %v3453_v59  ;;  %v2056_v57 = vor.u32 %v2055_v32, %v2051_v63  ;;  %v2060_v17 = vshll.u32 %v3423_v55, 16  ;;  %v1695_v3 = vld [vmem:[#allocation3 + $0x24] sm:$0x1]  ;;  %v2067_v36 = vshll.u32 %v4883_v14, 16  ;;  %v1904_v18 = vshll.u32 %v4886_v24, 16 }
 0x2ae   : > { %2935 = vmatmul.mubr.bf16.gmra.mrb[20].mxu0 %v3464_v21  ;;  %3668 = vmatpush3.bf16.msra.mxu1 %v3965_v37  ;;  %v2049_v49 = vor.u32 %v2048_v5, %v2044_v51  ;;  %v3441_v44 = vcombine.low %v4819_v48, %v4821_v19  ;;  %v1703_v7 = vld [vmem:[#allocation3 + $0x20] sm:$0xe]  ;;  %v4903_v62 = vcombine.low %v4888_v23, %v4890_v11  ;;  %v1694_v58 = vld [vmem:[#allocation3 + $0x1c] sm:$0x1]  ;;  %v1981_v38 = vrot.slane %v3411_v47, 1  ;;  %v3984_v19 = vld [vmem:[#allocation4 + $0x178] sm:$0xff]  }
 0x2af   : > { %3040 = vmatprep.mubr.bf16.mxu0 %v3442_v12  ;;  %2869 = vmatprep.mubr.bf16.mxu1 %v3463_v56  ;;  %v3980_v29 = vld [vmem:[#allocation4 + $0x130] sm:$0xff]   ;;  %v2062_v25 = vrot.slane %v2060_v17, 1  ;;  %v4907_v34 = vcombine.low %v4893_v46, %v4895_v40  ;;  %v1913_v21 = vrot.slane %v1911_v10, 1  ;;  %v4910_v6 = vcombine.low %v4781_v42, %v1695_v3  ;;  %v1702_v1 = vld [vmem:[#allocation3 + $0x18] sm:$0xe] }
 0x2b0   : > { %3669 = vmatprep.subr.bf16.mxu1 %v3971_v43  ;;  %v3451_v8 = vcombine.low %v2049_v49, %v2056_v57  ;;  %v3462_v48 = vcombine.low %v4836_v41, %v4838_v27  ;;  %v3440_v2 = vcombine.low %v1981_v38, %v1982_v45  ;;  %v3414_v37 = vcombine.low %v1703_v7, %v1695_v3  ;;  %v1705_v10 = vld [vmem:[#allocation3 + $0x30] sm:$0xe] }
 0x2b1   : > { %v2058_v56 = vshrl.u32 %v3423_v55, 16  ;;  %v2069_v12 = vrot.slane %v2067_v36, 1  ;;  %v1906_v30 = vrot.slane %v1904_v18, 1  ;;  %v1909_v59 = vshrl.u32 %v4875_v20, 16  ;;  %v3991_v20 = vld [vmem:[#allocation4 + $0x200] sm:$0xff]  }
 0x2b2   : > { %3670 = vmatpush3.bf16.msra.mxu1 %v3973_v60  ;;  %v3405_v43 = vcombine.low %v4786_v22, %v1694_v58  ;;  %v2081_v42 = vshll.u32 %v4903_v62, 16  ;;  %v3413_v41 = vcombine.low %v1702_v1, %v1694_v58  ;;  %v2065_v13 = vshrl.u32 %v4883_v14, 16  ;;  %v1697_v22 = vld [vmem:[#allocation3 + $0x34] sm:$0x1]  ;;  %v1704_v58 = vld [vmem:[#allocation3 + $0x28] sm:$0xe] }
 0x2b3   : > { %3671 = vmatprep.subr.bf16.mxu1 %v3977_v52  ;;  %v2063_v27 = vor.u32 %v2062_v25, %v2058_v56  ;;  %v2074_v63 = vshll.u32 %v4907_v34, 16  ;;  %v1902_v5 = vshrl.u32 %v4886_v24, 16  ;;  %v1914_v32 = vor.u32 %v1913_v21, %v1909_v59  ;;  %v1696_v52 = vld [vmem:[#allocation3 + $0x2c] sm:$0x1]  ;;  %v1698_v59 = vld [vmem:[#allocation3 + $0x3c] sm:$0x1] }
 0x2b4   : > { %v1925_v55 = vshll.u32 %v4910_v6, 16  ;;  %v1984_v60 = vrot.slane %v3414_v37, 1  ;;  %v2070_v47 = vor.u32 %v2069_v12, %v2065_v13  ;;  %v1918_v57 = vshll.u32 %v3405_v43, 16  ;;  %v1699_v37 = vld [vmem:[#allocation3 + $0x44] sm:$0x1] }
 0x2b5   : > { %2870 = vmatmul.mubr.bf16.gmra.mrb[12].mxu1 %v3462_v48  ;;  %v1907_v51 = vor.u32 %v1906_v30, %v1902_v5  ;;  %v3450_v17 = vcombine.low %v4854_v4, %v4858_v54  ;;  %v2079_v14 = vshrl.u32 %v4903_v62, 16  ;;  %v1983_v3 = vrot.slane %v3413_v41, 1  ;;  %v1707_v30 = vld [vmem:[#allocation3 + $0x40] sm:$0xe]  ;;  %v1706_v13 = vld [vmem:[#allocation3 + $0x38] sm:$0xe] }
 0x2b6   : > { %3041 = vmatmul.mubr.bf16.vlgmr.msra.gmra.mrb[24].mxu0 %v3441_v44  ;;  %3672 = vmatpush3.bf16.msra.mxu1 %v3980_v29  ;;  %v3460_v24 = vcombine.low %v2063_v27, %v2070_v47  ;;  %v2076_v45 = vrot.slane %v2074_v63, 1  ;;  %v2083_v49 = vrot.slane %v2081_v42, 1  ;;  %v3408_v36 = vcombine.low %v4829_v33, %v1697_v22  ;;  %v3995_v44 = vld [vmem:[#allocation4 + $0x208] sm:$0xff]   ;;  %v4002_v27 = vld [vmem:[#allocation4 + $0x218] sm:$0xff]  }
 0x2b7   : > { %3048 = vmatprep.mubr.bf16.mxu0 %v3451_v8  ;;  %2975 = vmatprep.mubr.bf16.mxu1 %v3440_v2  ;;  %v3439_v18 = vcombine.low %v1907_v51, %v1914_v32  ;;  %v1927_v7 = vrot.slane %v1925_v55, 1  ;;  %v3449_v29 = vcombine.low %v1983_v3, %v1984_v60  ;;  %v3416_v4 = vcombine.low %v1705_v10, %v1697_v22  ;;  %v1725_v10 = vld [vmem:[#allocation3 + $0x10] sm:$0xe] }
 0x2b8   : > { %3673 = vmatprep.subr.bf16.mxu1 %v3984_v19  ;;  %v2072_v54 = vshrl.u32 %v4907_v34, 16  ;;  %v3407_v62 = vcombine.low %v4827_v61, %v1696_v52  ;;  %v1920_v38 = vrot.slane %v1918_v57, 1  ;;  %v1923_v8 = vshrl.u32 %v4910_v6, 16  ;;  %v3998_v19 = vld [vmem:[#allocation4 + $0x210] sm:$0xff]  }
 0x2b9   : > { %v3415_v33 = vcombine.low %v1704_v58, %v1696_v52  ;;  %v2084_v21 = vor.u32 %v2083_v49, %v2079_v14  ;;  %v1939_v48 = vshll.u32 %v3408_v36, 16  ;;  %v1916_v1 = vshrl.u32 %v3405_v43, 16  ;;  %v4009_v52 = vld [vmem:[#allocation4 + $0x228] sm:$0xff]   ;;  %v1728_v58 = vld [vmem:[#allocation3 + $0x28] sm:$0xe] }
 0x2ba   : > { %3674 = vmatpush3.bf16.msra.mxu1 %v3986_v9  ;;  %v2077_v25 = vor.u32 %v2076_v45, %v2072_v54  ;;  %v1928_v2 = vor.u32 %v1927_v7, %v1923_v8  ;;  %v1986_v56 = vrot.slane %v3416_v4, 1  ;;  %v1932_v12 = vshll.u32 %v3407_v62, 16  ;;  %v1729_v54 = vld [vmem:[#allocation3 + $0x30] sm:$0xe] }
 0x2bb   : > { %3765 = vmatprep.subr.bf16.mxu1 %v3991_v20  ;;  %v1921_v34 = vor.u32 %v1920_v38, %v1916_v1  ;;  %v3459_v61 = vcombine.low %v4866_v0, %v4868_v53  ;;  %v1985_v6 = vrot.slane %v3415_v33, 1  ;;  %v3410_v9 = vcombine.low %v4842_v16, %v1699_v37  ;;  %v4005_v16 = vld [vmem:[#allocation4 + $0x220] sm:$0xff]   ;;  %v4013_v33 = vld [vmem:[#allocation4 + $0x238] sm:$0xff]  }
 0x2bc   : > { %v3469_v42 = vcombine.low %v2077_v25, %v2084_v21  ;;  %v1941_v43 = vrot.slane %v1939_v48, 1  ;;  %v3418_v5 = vcombine.low %v1707_v30, %v1699_v37  ;;  %v3409_v32 = vcombine.low %v4850_v39, %v1698_v59  ;;  %v1730_v25 = vld [vmem:[#allocation3 + $0x38] sm:$0xe]  ;;  %v1731_v37 = vld [vmem:[#allocation3 + $0x40] sm:$0xe] }
 0x2bd   : > { %2976 = vmatmul.mubr.bf16.vlgmr.msra.gmra.mrb[16].mxu1 %v3439_v18  ;;  %v3448_v41 = vcombine.low %v1921_v34, %v1928_v2  ;;  %v3458_v63 = vcombine.low %v1985_v6, %v1986_v56  ;;  %v1934_v0 = vrot.slane %v1932_v12, 1  ;;  %v1937_v53 = vshrl.u32 %v3408_v36, 16  ;;  %v1732_v56 = vld [vmem:[#allocation3 + $0x48] sm:$0xe] }
 0x2be   : > { %3049 = vmatmul.mubr.bf16.gmra.mrb[28].mxu0 %v3450_v17  ;;  %3766 = vmatpush3.bf16.msra.mxu1 %v3991_v20  ;;  %v3417_v55 = vcombine.low %v1706_v13, %v1698_v59  ;;  %v1953_v20 = vshll.u32 %v3410_v9, 16  ;;  %v1930_v22 = vshrl.u32 %v3407_v62, 16  ;;  %v1988_v47 = vrot.slane %v3418_v5, 1  ;;  %v1727_v62 = vld [vmem:[#allocation3 + $0x20] sm:$0xe] }
 0x2bf   : > { %3056 = vmatprep.mubr.bf16.mxu0 %v3460_v24  ;;  %2983 = vmatprep.mubr.bf16.mxu1 %v3449_v29  ;;  %v1942_v60 = vor.u32 %v1941_v43, %v1937_v53  ;;  %v1946_v51 = vshll.u32 %v3409_v32, 16  ;;  %v3468_v17 = vcombine.low %v4893_v46, %v4888_v23  ;;  %v1726_v24 = vld [vmem:[#allocation3 + $0x18] sm:$0xe]  ;;  %v3427_v49 = vcombine.low %v1725_v10, %v4825_v31  ;;  %v4010_v23 = vld [vmem:[#allocation4 + $0x230] sm:$0xff]  }
 0x2c0   : > { %3767 = vmatprep.subr.bf16.mxu1 %v3995_v44  ;;  %v1935_v57 = vor.u32 %v1934_v0, %v1930_v22  ;;  %v1987_v39 = vrot.slane %v3417_v55, 1  ;;  %v1955_v3 = vrot.slane %v1953_v20, 1  ;;  %v1951_v18 = vshrl.u32 %v3410_v9, 16 }
 0x2c1   : > { %v1948_v36 = vrot.slane %v1946_v51, 1  ;;  %v1944_v46 = vshrl.u32 %v3409_v32, 16  ;;  %v2109_v29 = vrot.slane %v3427_v49, 1  ;;  %v3430_v31 = vcombine.low %v1728_v58, %v4860_v50 }
 0x2c2   : > { %3768 = vmatpush3.bf16.msra.mxu1 %v3995_v44  ;;  %v3457_v14 = vcombine.low %v1935_v57, %v1942_v60  ;;  %v3467_v45 = vcombine.low %v1987_v39, %v1988_v47  ;;  %v3428_v44 = vcombine.low %v1726_v24, %v4832_v35  ;;  %v1956_v7 = vor.u32 %v1955_v3, %v1951_v18 }
 0x2c3   : > { %3769 = vmatprep.subr.bf16.mxu1 %v3998_v19  ;;  %v1949_v4 = vor.u32 %v1948_v36, %v1944_v46  ;;  %v3431_v35 = vcombine.low %v1729_v54, %v4870_v28  ;;  %v3429_v48 = vcombine.low %v1727_v62, %v4856_v15  ;;  %v2112_v1 = vrot.slane %v3430_v31, 1 }
 0x2c4   : > { %v2110_v38 = vrot.slane %v3428_v44, 1  ;;  %v3434_v28 = vcombine.low %v1732_v56, %v4890_v11 }
 0x2c5   : > { %2984 = vmatmul.mubr.bf16.gmra.mrb[20].mxu1 %v3448_v41  ;;  %v3466_v8 = vcombine.low %v1949_v4, %v1956_v7  ;;  %v2113_v2 = vrot.slane %v3431_v35, 1  ;;  %v2111_v50 = vrot.slane %v3429_v48, 1 }
 0x2c6   : > { %3057 = vmatmul.mubr.bf16.gmra.mrb[32].mxu0 %v3459_v61  ;;  %3770 = vmatpush3.bf16.msra.mxu1 %v3998_v19  ;;  %v3443_v21 = vcombine.low %v2109_v29, %v2110_v38  ;;  %v3432_v19 = vcombine.low %v1730_v25, %v4872_v26  ;;  %v3433_v61 = vcombine.low %v1731_v37, %v4895_v40  ;;  %v2116_v59 = vrot.slane %v3434_v28, 1 }
 0x2c7   : > { %3064 = vmatprep.mubr.bf16.mxu0 %v3469_v42  ;;  %2991 = vmatprep.mubr.bf16.mxu1 %v3458_v63  ;;  %v3452_v34 = vcombine.low %v2111_v50, %v2112_v1 }
 0x2c8   : > { %3771 = vmatprep.subr.bf16.mxu1 %v4002_v27  ;;  %v2114_v12 = vrot.slane %v3432_v19, 1  ;;  %v2115_v15 = vrot.slane %v3433_v61, 1 }
 0x2ca   : > { %3772 = vmatpush3.bf16.msra.mxu1 %v4002_v27  ;;  %v3461_v30 = vcombine.low %v2113_v2, %v2114_v12  ;;  %v3470_v6 = vcombine.low %v2115_v15, %v2116_v59 }
 0x2cb   : > { %3773 = vmatprep.subr.bf16.mxu1 %v4005_v16 }
 0x2cd   : > { %2992 = vmatmul.mubr.bf16.gmra.mrb[24].mxu1 %v3457_v14 }
 0x2ce   : > { %3065 = vmatmul.mubr.bf16.gmra.mrb[36].mxu0 %v3468_v17  ;;  %3774 = vmatpush3.bf16.msra.mxu1 %v4005_v16 }
 0x2cf   : > { %2999 = vmatprep.mubr.bf16.mxu1 %v3467_v45  ;;  %3775 = vmatprep.subr.bf16.mxu1 %v4009_v52 }
 0x2d2   : > { %3776 = vmatpush3.bf16.msra.mxu1 %v4009_v52 }
 0x2d3   : > { %3777 = vmatprep.subr.bf16.mxu1 %v4010_v23 }
 0x2d5   : > { %3000 = vmatmul.mubr.bf16.gmra.mrb[28].mxu1 %v3466_v8 }
 0x2d6   : > { %3778 = vmatpush3.bf16.msra.mxu1 %v4010_v23  ;;  %3781 = vmatprep.mubr.bf16.mxu1 %v3443_v21 }
 0x2d7   : > { %3779 = vmatprep.subr.bf16.mxu1 %v4013_v33 }
 0x2da   : > { %3780 = vmatpush3.bf16.msra.mxu1 %v4013_v33 }
 0x2dd   : > { %3782 = vmatmul.mubr.bf16.vlgmr.msra.gmra.mrb[32].mxu1 %v3452_v34 }
 0x2de   : > { %3785 = vmatprep.mubr.bf16.mxu1 %v3461_v30 }
 0x2e5   : > { %3786 = vmatmul.mubr.bf16.gmra.mrb[36].mxu1 %v3470_v6 }
 0x362   : > { %v3635_v26 = vpop.f32.mrb[8].mxu0 }
 0x363   : > { %v3636_v42 = vpop.f32.mrb[9].mxu0 }
 0x364   : > { %v3637_v9 = vadd.f32 %v3636_v42, %v3635_v26  ;;  %v3638_v41 = vpop.f32.mrb[10].mxu0 }
 0x365   : > { %v3639_v27 = vpop.f32.mrb[11].mxu0 }
 0x366   : > { %v3640_v43 = vadd.f32 %v3639_v27, %v3638_v41 }
 0x370   : > { %v3641_v13 = vpop.f32.mrb[12].mxu0  ;;  %v3595_v5 = vpop.f32.mrb[0].mxu1 }
 0x371   : > { %v3642_v63 = vpop.f32.mrb[13].mxu0  ;;  %v3596_v0 = vpop.f32.mrb[1].mxu1 }
 0x372   : > { %v3643_v32 = vadd.f32 %v3642_v63, %v3641_v13  ;;  %v3644_v40 = vpop.f32.mrb[14].mxu0  ;;  %v3597_v53 = vadd.f32 %v3596_v0, %v3595_v5  ;;  %v3598_v55 = vpop.f32.mrb[2].mxu1 }
 0x373   : > { %v3645_v11 = vpop.f32.mrb[15].mxu0  ;;  %v3599_v16 = vpop.f32.mrb[3].mxu1 }
 0x374   : > { %v3646_v20 = vadd.f32 %v3645_v11, %v3644_v40  ;;  %v2913_v22 = vadd.f32 %v3637_v9, %v3597_v53  ;;  %v3600_v60 = vadd.f32 %v3599_v16, %v3598_v55 }
 0x376   : > { %v2916_v47 = vadd.f32 %v3640_v43, %v3600_v60 }
 0x378   : > { %v3601_v17 = vpop.f32.mrb[4].mxu1 }
 0x379   : > { %v3647_v51 = vpop.f32.mrb[16].mxu0  ;;  %v3602_v14 = vpop.f32.mrb[5].mxu1 }
 0x37a   : > { %v3648_v57 = vpop.f32.mrb[17].mxu0  ;;  %v3603_v3 = vadd.f32 %v3602_v14, %v3601_v17  ;;  %v3604_v24 = vpop.f32.mrb[6].mxu1 }
 0x37b   : > { %v3649_v10 = vadd.f32 %v3648_v57, %v3647_v51  ;;  %v3650_v39 = vpop.f32.mrb[18].mxu0  ;;  %v3605_v49 = vpop.f32.mrb[7].mxu1 }
 0x37c   : > { %v3651_v52 = vpop.f32.mrb[19].mxu0  ;;  %v2921_v36 = vadd.f32 %v3643_v32, %v3603_v3  ;;  %v3606_v18 = vadd.f32 %v3605_v49, %v3604_v24 }
 0x37d   : > { %v3652_v45 = vadd.f32 %v3651_v52, %v3650_v39 }
 0x37e   : > { %v2924_v44 = vadd.f32 %v3646_v20, %v3606_v18 }
 0x380   : > { %v3607_v7 = vpop.f32.mrb[8].mxu1 }
 0x381   : > { %v3653_v23 = vpop.f32.mrb[20].mxu0  ;;  %v3608_v4 = vpop.f32.mrb[9].mxu1 }
 0x382   : > { %v3654_v46 = vpop.f32.mrb[21].mxu0  ;;  %v3609_v62 = vadd.f32 %v3608_v4, %v3607_v7  ;;  %v3610_v38 = vpop.f32.mrb[10].mxu1 }
 0x383   : > { %v3655_v58 = vadd.f32 %v3654_v46, %v3653_v23  ;;  %v3656_v29 = vpop.f32.mrb[22].mxu0  ;;  %v3611_v8 = vpop.f32.mrb[11].mxu1 }
 0x384   : > { %v3657_v54 = vpop.f32.mrb[23].mxu0  ;;  %v2929_v33 = vadd.f32 %v3649_v10, %v3609_v62  ;;  %v3612_v25 = vadd.f32 %v3611_v8, %v3610_v38 }
 0x385   : > { %v3658_v31 = vadd.f32 %v3657_v54, %v3656_v29 }
 0x386   : > { %v2932_v21 = vadd.f32 %v3652_v45, %v3612_v25 }
 0x388   : > { %v3613_v19 = vpop.f32.mrb[12].mxu1 }
 0x389   : > { %v3715_v35 = vpop.f32.mrb[24].mxu0  ;;  %v3614_v37 = vpop.f32.mrb[13].mxu1 }
 0x38a   : > { %v3716_v48 = vpop.f32.mrb[25].mxu0  ;;  %v3615_v50 = vadd.f32 %v3614_v37, %v3613_v19  ;;  %v3616_v12 = vpop.f32.mrb[14].mxu1 }
 0x38b   : > { %v3717_v1 = vadd.f32 %v3716_v48, %v3715_v35  ;;  %v3718_v2 = vpop.f32.mrb[26].mxu0  ;;  %v3617_v61 = vpop.f32.mrb[15].mxu1 }
 0x38c   : > { %v3719_v56 = vpop.f32.mrb[27].mxu0  ;;  %v2937_v28 = vadd.f32 %v3655_v58, %v3615_v50  ;;  %v3618_v30 = vadd.f32 %v3617_v61, %v3616_v12  ;;  %v3543_v61 = vld [vmem:[%s4960_s5] ss:$0 sm:$0xff] }
 0x38d   : > { %v3720_v34 = vadd.f32 %v3719_v56, %v3718_v2 }
 0x38e   : > { %v2940_v15 = vadd.f32 %v3658_v31, %v3618_v30 }
 0x390   : > { %v3675_v26 = vpop.f32.mrb[16].mxu1 }
 0x391   : > { %v3721_v59 = vpop.f32.mrb[28].mxu0  ;;  %v3676_v41 = vpop.f32.mrb[17].mxu1 }
 0x392   : > { %v3722_v6 = vpop.f32.mrb[29].mxu0  ;;  %v3677_v43 = vadd.f32 %v3676_v41, %v3675_v26  ;;  %v3678_v13 = vpop.f32.mrb[18].mxu1 }
 0x393   : > { %v3723_v42 = vadd.f32 %v3722_v6, %v3721_v59  ;;  %v3724_v9 = vpop.f32.mrb[30].mxu0  ;;  %v3679_v5 = vpop.f32.mrb[19].mxu1  ;;  %v3544_v59 = vld [vmem:[%s4961_s6] ss:$0 sm:$0xff] }
 0x394   : > { %v3725_v27 = vpop.f32.mrb[31].mxu0  ;;  %v2978_v32 = vadd.f32 %v3677_v43, %v2913_v22  ;;  %v3680_v40 = vadd.f32 %v3679_v5, %v3678_v13 }
 0x395   : > { %v3726_v63 = vadd.f32 %v3725_v27, %v3724_v9 }
 0x396   : > { %v2981_v0 = vadd.f32 %v3680_v40, %v2916_v47  ;;  %v3043_v53 = vadd.f32 %v3717_v1, %v2978_v32 }
 0x398   : > { %v3681_v20 = vpop.f32.mrb[20].mxu1  ;;  %v3046_v51 = vadd.f32 %v3720_v34, %v2981_v0 }
 0x399   : > { %v3727_v11 = vpop.f32.mrb[32].mxu0  ;;  %v3682_v57 = vpop.f32.mrb[21].mxu1 }
 0x39a   : > { %v3728_v55 = vpop.f32.mrb[33].mxu0  ;;  %v3683_v10 = vadd.f32 %v3682_v57, %v3681_v20  ;;  %v3684_v39 = vpop.f32.mrb[22].mxu1 }
 0x39b   : > { %v3729_v16 = vadd.f32 %v3728_v55, %v3727_v11  ;;  %v3730_v60 = vpop.f32.mrb[34].mxu0  ;;  %v3685_v52 = vpop.f32.mrb[23].mxu1 }
 0x39c   : > { %v3731_v17 = vpop.f32.mrb[35].mxu0  ;;  %v2986_v3 = vadd.f32 %v3683_v10, %v2921_v36  ;;  %v3686_v24 = vadd.f32 %v3685_v52, %v3684_v39 }
 0x39d   : > { %v3732_v14 = vadd.f32 %v3731_v17, %v3730_v60 }
 0x39e   : > { %v2989_v45 = vadd.f32 %v3686_v24, %v2924_v44  ;;  %v3051_v22 = vadd.f32 %v3723_v42, %v2986_v3 }
 0x3a0   : > { %v3687_v47 = vpop.f32.mrb[24].mxu1  ;;  %v3054_v7 = vadd.f32 %v3726_v63, %v2989_v45 }
 0x3a1   : > { %v3733_v49 = vpop.f32.mrb[36].mxu0  ;;  %v3688_v58 = vpop.f32.mrb[25].mxu1 }
 0x3a2   : > { %v3734_v18 = vpop.f32.mrb[37].mxu0  ;;  %v3689_v4 = vadd.f32 %v3688_v58, %v3687_v47  ;;  %v3690_v54 = vpop.f32.mrb[26].mxu1 }
 0x3a3   : > { %v3735_v23 = vadd.f32 %v3734_v18, %v3733_v49  ;;  %v3736_v46 = vpop.f32.mrb[38].mxu0  ;;  %v3691_v38 = vpop.f32.mrb[27].mxu1 }
 0x3a4   : > { %v3737_v29 = vpop.f32.mrb[39].mxu0  ;;  %v2994_v31 = vadd.f32 %v3689_v4, %v2929_v33  ;;  %v3692_v8 = vadd.f32 %v3691_v38, %v3690_v54 }
 0x3a5   : > { %v3738_v62 = vadd.f32 %v3737_v29, %v3736_v46 }
 0x3a6   : > { %v2997_v25 = vadd.f32 %v3692_v8, %v2932_v21  ;;  %v3059_v35 = vadd.f32 %v3729_v16, %v2994_v31 }
 0x3a8   : > { %v3693_v36 = vpop.f32.mrb[28].mxu1  ;;  %v3062_v48 = vadd.f32 %v3732_v14, %v2997_v25 }
 0x3a9   : > { %v3694_v44 = vpop.f32.mrb[29].mxu1 }
 0x3aa   : > { %v3695_v19 = vadd.f32 %v3694_v44, %v3693_v36  ;;  %v3696_v1 = vpop.f32.mrb[30].mxu1 }
 0x3ab   : > { %v3697_v2 = vpop.f32.mrb[31].mxu1 }
 0x3ac   : > { %v3002_v37 = vadd.f32 %v3695_v19, %v2937_v28  ;;  %v3698_v56 = vadd.f32 %v3697_v2, %v3696_v1 }
 0x3ae   : > { %v3005_v50 = vadd.f32 %v3698_v56, %v2940_v15  ;;  %v3067_v12 = vadd.f32 %v3735_v23, %v3002_v37 }
 0x3b0   : > { %v3783_v34 = vpop.f32.mrb[32].mxu1  ;;  %v3070_v33 = vadd.f32 %v3738_v62, %v3005_v50 }
 0x3b1   : > { %v3116_v30 = vadd.f32 %v3783_v34, %v3051_v22  ;;  %v3107_v21 = vpop.f32.mrb[33].mxu1 }
 0x3b2   : > { %v3108_v6 = vadd.f32 %v3107_v21, %v3043_v53  ;;  %v3784_v26 = vpop.f32.mrb[34].mxu1 }
 0x3b3   : > { %v3147_v42 = vmul.f32 %v3543_v61, %v3116_v30  ;;  %v3119_v28 = vadd.f32 %v3784_v26, %v3054_v7  ;;  %v3110_v9 = vpop.f32.mrb[35].mxu1 }
 0x3b4   : > { %v3145_v15 = vmul.f32 %v3543_v61, %v3108_v6  ;;  %v3111_v41 = vadd.f32 %v3110_v9, %v3046_v51 }
 0x3b5   : > { %v3162_v27 = vadd.f32 %v3544_v59, %v3147_v42  ;;  %v3148_v43 = vmul.f32 %v3543_v61, %v3119_v28 }
 0x3b6   : > { %v3160_v13 = vadd.f32 %v3544_v59, %v3145_v15  ;;  %v3146_v63 = vmul.f32 %v3543_v61, %v3111_v41 }
 0x3b7   : > { %v3163_v5 = vadd.f32 %v3544_v59, %v3148_v43  ;;  %v3170_v0 = vmax.f32 %v3162_v27, 0.0 }
 0x3b8   : > { %v3161_v32 = vadd.f32 %v3544_v59, %v3146_v63  ;;  %v3787_v40 = vpop.f32.mrb[36].mxu1  ;;  %v3168_v16 = vmax.f32 %v3160_v13, 0.0 }
 0x3b9   : > { %v3171_v11 = vmax.f32 %v3163_v5, 0.0  ;;  %v3132_v55 = vadd.f32 %v3787_v40, %v3067_v12  ;;  %v3123_v20 = vpop.f32.mrb[37].mxu1 }
 0x3ba   : > { %v3169_v53 = vmax.f32 %v3161_v32, 0.0  ;;  %v3124_v60 = vadd.f32 %v3123_v20, %v3059_v35  ;;  %v3788_v51 = vpop.f32.mrb[38].mxu1 }
 0x3bb   : > { %v3557_v57 = vpack.c.bf16 %v3171_v11, %v3170_v0  ;;  %v3151_v17 = vmul.f32 %v3543_v61, %v3132_v55  ;;  %v3135_v10 = vadd.f32 %v3788_v51, %v3070_v33  ;;  %v3126_v39 = vpop.f32.mrb[39].mxu1 }
 0x3bc   : > { %v3552_v14 = vpack.c.bf16 %v3169_v53, %v3168_v16  ;;  %v3149_v52 = vmul.f32 %v3543_v61, %v3124_v60  ;;  %v3127_v3 = vadd.f32 %v3126_v39, %v3062_v48 }
 0x3bd   : > { %3569 = vst [vmem:[%s293_s30 + $0x8] sm:$0xff] %v3557_v57   ;;  %v3166_v24 = vadd.f32 %v3544_v59, %v3151_v17  ;;  %v3152_v45 = vmul.f32 %v3543_v61, %v3135_v10 }
 0x3be   : > { %3553 = vst [vmem:[%s293_s30] sm:$0xff] %v3552_v14   ;;  %v3164_v49 = vadd.f32 %v3544_v59, %v3149_v52  ;;  %v3150_v22 = vmul.f32 %v3543_v61, %v3127_v3 }
 0x3bf   : > { %v3167_v18 = vadd.f32 %v3544_v59, %v3152_v45  ;;  %v3174_v23 = vmax.f32 %v3166_v24, 0.0 }
 0x3c0   : > { %v3165_v47 = vadd.f32 %v3544_v59, %v3150_v22  ;;  %v3172_v7 = vmax.f32 %v3164_v49, 0.0 }
 0x3c1   : > { %v3175_v46 = vmax.f32 %v3167_v18, 0.0 }
 0x3c2   : > { %v3173_v58 = vmax.f32 %v3165_v47, 0.0 }
 0x3c3   : > { %v3567_v29 = vpack.c.bf16 %v3175_v46, %v3174_v23 }
 0x3c4   : > { %v3562_v4 = vpack.c.bf16 %v3173_v58, %v3172_v7 }
 0x3c5   : > { %3571 = vst [vmem:[%s293_s30 + $0x18] sm:$0xff] %v3567_v29  }
 0x3c6   : > { %3570 = vst [vmem:[%s293_s30 + $0x10] sm:$0xff] %v3562_v4  }
 0x3c7 PF: > { %s18_s24 = sadd.s32 1, %s4058_s24  }
 0x3c8   : > { %p15_p3 = scmp.ge.s32.totalorder %s18_s24, 4  }
 0x3ca   :  { %17 = sbr.rel (!%p15_p3) target bundleno = 1 (0x1), region = 89 }
 0x3d1   :  { %3213 = vsyncpa [#allocation5], 1 }
 0x3d2   :  { %3215 = vsyncpa [#allocation5 + $0x1], 1 }

</bundles_post_ra>
